<compile_context>
chip_gen: v7x
topology: tpu7x:2x2x1
jax: 0.10.0
libtpu: 0.0.40
codegen_flags: <defaults>
</compile_context>

<pallas_src>
import functools

import jax
import jax.numpy as jnp
from jax import lax
from jax.experimental import pallas as pl
from jax.experimental.pallas import tpu as pltpu


def _round_up(x, m):
    return ((x + m - 1) // m) * m


@functools.lru_cache(maxsize=None)
def _roll_direction():
    """Probe pltpu.roll's rotation direction once (tiny kernel, cached).

    Returns "fwd" if pltpu.roll(x, s, 1)[..., i] == x[..., (i - s) % n]  (jnp.roll),
            "rev" if pltpu.roll(x, s, 1)[..., i] == x[..., (i + s) % n],
            None  if the probe fails (the packed gate layout is then disabled).
    """
    try:
        def probe(o_ref):
            lanes = lax.broadcasted_iota(jnp.int32, (1, 128), 1)
            o_ref[...] = pltpu.roll(lanes, 96, 1)

        out = pl.pallas_call(
            probe, out_shape=jax.ShapeDtypeStruct((1, 128), jnp.int32))()
        first = int(out[0, 0])
        if first == 32:
            return "fwd"
        if first == 96:
            return "rev"
    except Exception:
        pass
    return None


def lstm_kernel(x_ref, wih_ref, whh_ref, b_ref, wlin_ref, blin_ref,
                out_ref, xp_scr, hh_scr, h_scr, c_scr, *,
                gs, gw, chunk, scalar_input, packed, gate_shifts, unroll):
    """One L-chunk of the LSTM recurrence + hoisted linear head.

    Gate layout (columns of the (., gw) gate matrices): [i | f | o | g], each block
    `gs` lanes wide.  packed=True: all four gates share one 128-lane vreg (gs = H).
    packed=False: each gate is padded to its own 128-lane block (gs = round_up(H,128)).
    """
    # Zero-init the carried hidden/cell state on the first chunk only.
    @pl.when(pl.program_id(0) == 0)
    def _():
        h_scr[...] = jnp.zeros_like(h_scr)
        c_scr[...] = jnp.zeros_like(c_scr)

    # ---- input projection for the whole chunk, hoisted out of the recurrence ----
    if scalar_input:
        # input_size == 1: broadcast multiply-add on the VPU, no MXU pass.
        xp_scr[...] = x_ref[...] * wih_ref[...] + b_ref[...]            # (chunk, gw)
    else:
        xp_scr[...] = (jnp.dot(x_ref[...], wih_ref[...],
                               preferred_element_type=jnp.float32) + b_ref[...])

    # Hoisted loop-invariant constants (JAX does not CSE broadcasts inside loops).
    lane = lax.broadcasted_iota(jnp.int32, (1, gw), 1)
    is_g = (lane >= 3 * gs) & (lane < 4 * gs)
    # sigmoid(x) = 0.5 * (1 + tanh(0.5 * x)) -> one tanh covers i/f/o and g lanes.
    scale = jnp.where(is_g, jnp.float32(1.0), jnp.float32(0.5))
    offset = jnp.where(is_g, jnp.float32(0.0), jnp.float32(0.5))
    whh = whh_ref[...]   # loop-invariant; small enough to stay vreg-resident when packed
    # TODO(synk): on v5e/v7x, staging W_hh explicitly via pltpu.matmul_push_rhs /
    # the MRB would remove per-step weight streaming entirely; kept on jnp.dot here.

    def step(t, carry):
        h, c = carry                                                    # (1, HP) each
        gates = xp_scr[pl.ds(t, 1), :] + jnp.dot(
            h, whh, preferred_element_type=jnp.float32)                 # (1, gw)
        th = jnp.tanh(gates * scale)        # single EUP pass per gate vreg
        act = th * scale + offset           # [ sig(i) | sig(f) | sig(o) | tanh(g) ]
        if packed:
            # All gates live in one 128-lane vreg; realign f/o/g onto lanes [0, H)
            # with XLU rolls.  Lanes >= H of h/c carry junk that is annihilated by
            # the zero rows of W_hh / W_lin.
            i_g = act
            f_g = pltpu.roll(act, gate_shifts[0], 1)
            o_g = pltpu.roll(act, gate_shifts[1], 1)
            g_g = pltpu.roll(act, gate_shifts[2], 1)
        else:
            i_g = act[:, 0 * gs:1 * gs]
            f_g = act[:, 1 * gs:2 * gs]
            o_g = act[:, 2 * gs:3 * gs]
            g_g = act[:, 3 * gs:4 * gs]
        c_new = f_g * c + i_g * g_g
        h_new = o_g * jnp.tanh(c_new)
        hh_scr[pl.ds(t, 1), :] = h_new      # h history for the hoisted linear head
        return (h_new, c_new)

    h_fin, c_fin = lax.fori_loop(0, chunk, step, (h_scr[...], c_scr[...]),
                                 unroll=unroll)
    h_scr[...] = h_fin                      # carry state to the next L-chunk
    c_scr[...] = c_fin

    # ---- linear head, hoisted: one matmul + one lane-dense store per chunk ----
    out_ref[...] = (jnp.dot(hh_scr[...], wlin_ref[...],
                            preferred_element_type=jnp.float32) + blin_ref[...])


def lstm_forward(input_seq, params, hidden, chunk_max=512):
    """Mirrors LSTM.forward(input_seq) with zero initial hidden_cell (batch = 1)."""
    L = int(input_seq.shape[0])
    x = input_seq.reshape(L, -1).astype(jnp.float32)      # (L, input_size)
    in_size = x.shape[1]
    H = hidden
    out_size = params["w_lin"].shape[0]
    out_pad = _round_up(out_size, 128)                    # lane-dense output store
    HP = _round_up(H, 128)                                # carried-state lane width

    # Small-H fast path: pack all four gates into a single 128-lane block.
    roll_dir = _roll_direction() if 4 * H <= 128 else None
    packed = roll_dir is not None
    if packed:
        GS, GW = H, 128
        if roll_dir == "fwd":
            gate_shifts = (GW - GS, GW - 2 * GS, GW - 3 * GS)   # f, o, g -> lanes [0, H)
        else:
            gate_shifts = (GS, 2 * GS, 3 * GS)
    else:
        GS, GW = HP, 4 * HP
        gate_shifts = None

    # Chunk the sequence so VMEM scratch stays bounded for long L (v7x: 64 MiB).
    chunk_max = _round_up(max(int(chunk_max), 8), 8)
    if L <= chunk_max:
        chunk, num_chunks = _round_up(L, 8), 1
    else:
        chunk = chunk_max
        num_chunks = -(-L // chunk)
    L_pad = chunk * num_chunks
    if L_pad != L:
        x = jnp.zeros((L_pad, in_size), jnp.float32).at[:L].set(x)

    # Permute PyTorch gate order [i, f, g, o] -> [i, f, o, g]; place each gate at
    # stride GS inside a GW-wide block.  Rows >= H of W_hh / W_lin are zero, which
    # annihilates any padding/junk lanes of the carried state.
    order = (0, 1, 3, 2)
    w_ih = params["w_ih"].astype(jnp.float32)             # (4H, in)
    w_hh = params["w_hh"].astype(jnp.float32)             # (4H, H)
    b = (params["b_ih"] + params["b_hh"]).astype(jnp.float32)   # (4H,)

    wih_t = jnp.zeros((in_size, GW), jnp.float32)
    whh_t = jnp.zeros((HP, GW), jnp.float32)
    bias = jnp.zeros((1, GW), jnp.float32)
    for new_g, old_g in enumerate(order):
        src = slice(old_g * H, (old_g + 1) * H)
        dst = slice(new_g * GS, new_g * GS + H)
        wih_t = wih_t.at[:, dst].set(w_ih[src, :].T)
        whh_t = whh_t.at[:H, dst].set(w_hh[src, :].T)
        bias = bias.at[0, dst].set(b[src])

    wlin_t = jnp.zeros((HP, out_pad), jnp.float32)
    wlin_t = wlin_t.at[:H, :out_size].set(params["w_lin"].astype(jnp.float32).T)
    blin = jnp.zeros((1, out_pad), jnp.float32)
    blin = blin.at[0, :out_size].set(params["b_lin"].astype(jnp.float32))
    # TODO(synk): weights could be cast to bf16 here to halve W_hh streaming; kept
    # f32 for tight numerical parity with the pure-f32 reference.

    kernel = functools.partial(
        lstm_kernel, gs=GS, gw=GW, chunk=chunk, scalar_input=(in_size == 1),
        packed=packed, gate_shifts=gate_shifts,
        unroll=(True if chunk <= 64 else 8))

    const_spec = lambda arr: pl.BlockSpec(arr.shape, lambda t: (0, 0))

    out_padded = pl.pallas_call(
        kernel,
        out_shape=jax.ShapeDtypeStruct((L_pad, out_pad), jnp.float32),
        grid=(num_chunks,),
        in_specs=[
            pl.BlockSpec((chunk, in_size), lambda t: (t, 0)),   # x, chunked over L
            const_spec(wih_t),
            const_spec(whh_t),
            const_spec(bias),
            const_spec(wlin_t),
            const_spec(blin),
        ],
        out_specs=pl.BlockSpec((chunk, out_pad), lambda t: (t, 0)),
        scratch_shapes=[
            pltpu.VMEM((chunk, GW), jnp.float32),   # x @ W_ih^T + b for this chunk
            pltpu.VMEM((chunk, HP), jnp.float32),   # h history for the linear head
            pltpu.VMEM((1, HP), jnp.float32),       # h carried across chunks
            pltpu.VMEM((1, HP), jnp.float32),       # c carried across chunks
        ],
        compiler_params=pltpu.CompilerParams(
            dimension_semantics=("arbitrary",),     # serial recurrence over L-chunks
            vmem_limit_bytes=64 * 1024 * 1024,      # raise scoped VMEM above the default
        ),
    )(x, wih_t, whh_t, bias, wlin_t, blin)

    # TODO(synk): if several independent sequences are ever available, add a leading
    # batch axis (sublane-stacked state, "parallel" grid dim / 2nd TC on v7x).
    return out_padded[:L, :out_size]


def lstm_reference(input_seq, params, hidden):
    """Pure-JAX reference (lax.scan), same semantics as torch nn.LSTM + Linear."""
    L = int(input_seq.shape[0])
    x = input_seq.reshape(L, -1).astype(jnp.float32)
    H = hidden
    w_ih, w_hh = params["w_ih"], params["w_hh"]
    b = params["b_ih"] + params["b_hh"]
    hi = jax.lax.Precision.HIGHEST

    def step(carry, x_t):
        h, c = carry
        gates = (jnp.dot(x_t, w_ih.T, precision=hi)
                 + jnp.dot(h, w_hh.T, precision=hi) + b)
        i_g = jax.nn.sigmoid(gates[0:H])
        f_g = jax.nn.sigmoid(gates[H:2 * H])
        g_g = jnp.tanh(gates[2 * H:3 * H])
        o_g = jax.nn.sigmoid(gates[3 * H:4 * H])
        c_new = f_g * c + i_g * g_g
        h_new = o_g * jnp.tanh(c_new)
        return (h_new, c_new), h_new

    init = (jnp.zeros((H,), jnp.float32), jnp.zeros((H,), jnp.float32))
    _, hs = lax.scan(step, init, x)
    return jnp.dot(hs, params["w_lin"].T, precision=hi) + params["b_lin"]


def init_params(key, input_size, hidden, output_size):
    """Deterministic init matching PyTorch's U(-1/sqrt(H), 1/sqrt(H)) scheme."""
    k = 1.0 / jnp.sqrt(jnp.float32(hidden))
    ks = jax.random.split(key, 6)
    u = lambda kk, shape: jax.random.uniform(kk, shape, jnp.float32, -k, k)
    return {
        "w_ih": u(ks[0], (4 * hidden, input_size)),
        "w_hh": u(ks[1], (4 * hidden, hidden)),
        "b_ih": u(ks[2], (4 * hidden,)),
        "b_hh": u(ks[3], (4 * hidden,)),
        "w_lin": u(ks[4], (output_size, hidden)),
        "b_lin": u(ks[5], (output_size,)),
    }


if __name__ == "__main__":
    key = jax.random.PRNGKey(0)
    k_p1, k_d1, k_p2, k_d2 = jax.random.split(key, 4)

    # Case 1: small demo config -> packed single-vreg gate path, one chunk, full unroll.
    L1, IN, H1, OUT = 8, 1, 32, 1
    params1 = init_params(k_p1, IN, H1, OUT)
    seq1 = jax.random.normal(k_d1, (L1,), jnp.float32)
    preds1 = jax.block_until_ready(lstm_forward(seq1, params1, H1))
    ref1 = lstm_reference(seq1, params1, H1)
    assert preds1.shape == (L1, OUT)
    err1 = jnp.max(jnp.abs(preds1 - ref1))
    assert jnp.allclose(preds1, ref1, atol=1e-4, rtol=1e-4), f"case1 max err {err1}"

    # Case 2: module-default hidden size (100) -> per-gate-128 layout, 3 L-chunks with
    # h/c carried across grid steps.
    L2, H2 = 40, 100
    params2 = init_params(k_p2, IN, H2, OUT)
    seq2 = jax.random.normal(k_d2, (L2,), jnp.float32)
    preds2 = jax.block_until_ready(lstm_forward(seq2, params2, H2, chunk_max=16))
    ref2 = lstm_reference(seq2, params2, H2)
    assert preds2.shape == (L2, OUT)
    err2 = jnp.max(jnp.abs(preds2 - ref2))
    assert jnp.allclose(preds2, ref2, atol=1e-4, rtol=1e-4), f"case2 max err {err2}"

    print("KERNEL_OK")
</pallas_src>

<mosaic_0001>
module attributes {stable_mosaic.version = 11 : i64} {
  func.func @lstm_kernel(%arg0: i32, %arg1: memref<8x1xf32, #tpu.memory_space<vmem>>, %arg2: memref<1x512xf32, #tpu.memory_space<vmem>>, %arg3: memref<128x512xf32, #tpu.memory_space<vmem>>, %arg4: memref<1x512xf32, #tpu.memory_space<vmem>>, %arg5: memref<128x128xf32, #tpu.memory_space<vmem>>, %arg6: memref<1x128xf32, #tpu.memory_space<vmem>>, %arg7: memref<8x128xf32, #tpu.memory_space<vmem>>, %arg8: memref<8x512xf32, #tpu.memory_space<vmem>>, %arg9: memref<8x128xf32, #tpu.memory_space<vmem>>, %arg10: memref<1x128xf32, #tpu.memory_space<vmem>>, %arg11: memref<1x128xf32, #tpu.memory_space<vmem>>) attributes {dimension_semantics = [#tpu.dimension_semantics<arbitrary>], iteration_bounds = array<i64: 1>, scalar_prefetch = 0 : i64, scratch_operands = 4 : i64, tpu.core_type = #tpu.core_type<tc>, window_params = [{transform_indices = @transform_0, window_bounds = array<i64: 8, 1>}, {pipeline_mode = #tpu.pipeline_mode<synchronous>, transform_indices = @transform_1, window_bounds = array<i64: 1, 512>}, {pipeline_mode = #tpu.pipeline_mode<synchronous>, transform_indices = @transform_2, window_bounds = array<i64: 128, 512>}, {pipeline_mode = #tpu.pipeline_mode<synchronous>, transform_indices = @transform_3, window_bounds = array<i64: 1, 512>}, {pipeline_mode = #tpu.pipeline_mode<synchronous>, transform_indices = @transform_4, window_bounds = array<i64: 128, 128>}, {pipeline_mode = #tpu.pipeline_mode<synchronous>, transform_indices = @transform_5, window_bounds = array<i64: 1, 128>}, {transform_indices = @transform_6, window_bounds = array<i64: 8, 128>}]} {
    %c0_i32 = arith.constant 0 : i32
    %0 = arith.cmpi eq, %arg0, %c0_i32 : i32
    %1 = arith.extui %0 : i1 to i32
    %c0_i32_0 = arith.constant 0 : i32
    %2 = arith.cmpi ne, %1, %c0_i32_0 : i32
    scf.if %2 {
      %cst_55 = arith.constant 0.000000e+00 : f32
      %188 = vector.broadcast %cst_55 : f32 to vector<1x128xf32>
      %c0_56 = arith.constant 0 : index
      %c0_57 = arith.constant 0 : index
      %189 = vector.load %arg10[%c0_56, %c0_57] : memref<1x128xf32, #tpu.memory_space<vmem>>, vector<1x128xf32>
      tpu.vector_store %arg10[%c0_56, %c0_57], %188 {strides = array<i32>} : memref<1x128xf32, #tpu.memory_space<vmem>>, vector<1x128xf32>,
      %cst_58 = arith.constant 0.000000e+00 : f32
      %190 = vector.broadcast %cst_58 : f32 to vector<1x128xf32>
      %c0_59 = arith.constant 0 : index
      %c0_60 = arith.constant 0 : index
      %191 = vector.load %arg11[%c0_59, %c0_60] : memref<1x128xf32, #tpu.memory_space<vmem>>, vector<1x128xf32>
      tpu.vector_store %arg11[%c0_59, %c0_60], %190 {strides = array<i32>} : memref<1x128xf32, #tpu.memory_space<vmem>>, vector<1x128xf32>,
    } else {
    }
    %c0 = arith.constant 0 : index
    %c0_1 = arith.constant 0 : index
    %3 = vector.load %arg1[%c0, %c0_1] : memref<8x1xf32, #tpu.memory_space<vmem>>, vector<8x1xf32>
    %c0_2 = arith.constant 0 : index
    %c0_3 = arith.constant 0 : index
    %4 = vector.load %arg2[%c0_2, %c0_3] : memref<1x512xf32, #tpu.memory_space<vmem>>, vector<1x512xf32>
    %5 = vector.broadcast %3 : vector<8x1xf32> to vector<8x512xf32>
    %6 = vector.broadcast %4 : vector<1x512xf32> to vector<8x512xf32>
    %7 = arith.mulf %5, %6 : vector<8x512xf32>
    %c0_4 = arith.constant 0 : index
    %c0_5 = arith.constant 0 : index
    %8 = vector.load %arg4[%c0_4, %c0_5] : memref<1x512xf32, #tpu.memory_space<vmem>>, vector<1x512xf32>
    %9 = vector.broadcast %8 : vector<1x512xf32> to vector<8x512xf32>
    %10 = arith.addf %7, %9 : vector<8x512xf32>
    %c0_6 = arith.constant 0 : index
    %c0_7 = arith.constant 0 : index
    %11 = vector.load %arg8[%c0_6, %c0_7] : memref<8x512xf32, #tpu.memory_space<vmem>>, vector<8x512xf32>
    tpu.vector_store %arg8[%c0_6, %c0_7], %10 {strides = array<i32>} : memref<8x512xf32, #tpu.memory_space<vmem>>, vector<8x512xf32>,
    %12 = tpu.iota {dimensions = array<i32: 1>} : vector<1x512xi32>
    %c384_i32 = arith.constant 384 : i32
    %13 = vector.broadcast %c384_i32 : i32 to vector<1x512xi32>
    %14 = arith.cmpi sge, %12, %13 : vector<1x512xi32>
    %c512_i32 = arith.constant 512 : i32
    %15 = vector.broadcast %c512_i32 : i32 to vector<1x512xi32>
    %16 = arith.cmpi slt, %12, %15 : vector<1x512xi32>
    %17 = arith.andi %14, %16 : vector<1x512xi1>
    %cst = arith.constant 1.000000e+00 : f32
    %cst_8 = arith.constant 5.000000e-01 : f32
    %18 = vector.broadcast %cst : f32 to vector<1x512xf32>
    %19 = vector.broadcast %cst_8 : f32 to vector<1x512xf32>
    %20 = arith.select %17, %18, %19 : vector<1x512xi1>, vector<1x512xf32>
    %cst_9 = arith.constant 0.000000e+00 : f32
    %cst_10 = arith.constant 5.000000e-01 : f32
    %21 = vector.broadcast %cst_9 : f32 to vector<1x512xf32>
    %22 = vector.broadcast %cst_10 : f32 to vector<1x512xf32>
    %23 = arith.select %17, %21, %22 : vector<1x512xi1>, vector<1x512xf32>
    %c0_11 = arith.constant 0 : index
    %c0_12 = arith.constant 0 : index
    %24 = vector.load %arg3[%c0_11, %c0_12] : memref<128x512xf32, #tpu.memory_space<vmem>>, vector<128x512xf32>
    %c0_13 = arith.constant 0 : index
    %c0_14 = arith.constant 0 : index
    %25 = vector.load %arg10[%c0_13, %c0_14] : memref<1x128xf32, #tpu.memory_space<vmem>>, vector<1x128xf32>
    %c0_15 = arith.constant 0 : index
    %c0_16 = arith.constant 0 : index
    %26 = vector.load %arg11[%c0_15, %c0_16] : memref<1x128xf32, #tpu.memory_space<vmem>>, vector<1x128xf32>
    %c0_i32_17 = arith.constant 0 : i32
    %27 = arith.index_cast %c0_i32_17 : i32 to index
    %c0_18 = arith.constant 0 : index
    %28 = vector.load %arg8[%27, %c0_18] : memref<8x512xf32, #tpu.memory_space<vmem>>, vector<1x512xf32>
    %cst_19 = arith.constant dense<0.000000e+00> : vector<1x512xf32>
    %29 = tpu.matmul %25, %24, %cst_19 {dimension_numbers = #tpu.dot_dimension_numbers<[1], [0], [0], [1], [0, 0, 1, 1], [], []>} : vector<1x128xf32>, vector<128x512xf32>, vector<1x512xf32> -> vector<1x512xf32>
    %30 = arith.addf %28, %29 : vector<1x512xf32>
    %31 = arith.mulf %30, %20 : vector<1x512xf32>
    %32 = math.tanh %31 : vector<1x512xf32>
    %33 = arith.mulf %32, %20 : vector<1x512xf32>
    %34 = arith.addf %33, %23 : vector<1x512xf32>
    %35 = vector.extract_strided_slice %34 {offsets = [0, 0], sizes = [1, 128], strides = [1, 1]} : vector<1x512xf32> to vector<1x128xf32>
    %36 = vector.extract_strided_slice %34 {offsets = [0, 128], sizes = [1, 128], strides = [1, 1]} : vector<1x512xf32> to vector<1x128xf32>
    %37 = vector.extract_strided_slice %34 {offsets = [0, 256], sizes = [1, 128], strides = [1, 1]} : vector<1x512xf32> to vector<1x128xf32>
    %38 = vector.extract_strided_slice %34 {offsets = [0, 384], sizes = [1, 128], strides = [1, 1]} : vector<1x512xf32> to vector<1x128xf32>
    %39 = arith.mulf %36, %26 : vector<1x128xf32>
    %40 = arith.mulf %35, %38 : vector<1x128xf32>
    %41 = arith.addf %39, %40 : vector<1x128xf32>
    %42 = math.tanh %41 : vector<1x128xf32>
    %43 = arith.mulf %37, %42 : vector<1x128xf32>
    %44 = arith.index_cast %c0_i32_17 : i32 to index
    %c0_20 = arith.constant 0 : index
    %45 = vector.load %arg9[%44, %c0_20] : memref<8x128xf32, #tpu.memory_space<vmem>>, vector<1x128xf32>
    tpu.vector_store %arg9[%44, %c0_20], %43 {strides = array<i32>} : memref<8x128xf32, #tpu.memory_space<vmem>>, vector<1x128xf32>,
    %c1_i32 = arith.constant 1 : i32
    %46 = arith.index_cast %c1_i32 : i32 to index
    %c0_21 = arith.constant 0 : index
    %47 = vector.load %arg8[%46, %c0_21] : memref<8x512xf32, #tpu.memory_space<vmem>>, vector<1x512xf32>
    %cst_22 = arith.constant dense<0.000000e+00> : vector<1x512xf32>
    %48 = tpu.matmul %43, %24, %cst_22 {dimension_numbers = #tpu.dot_dimension_numbers<[1], [0], [0], [1], [0, 0, 1, 1], [], []>} : vector<1x128xf32>, vector<128x512xf32>, vector<1x512xf32> -> vector<1x512xf32>
    %49 = arith.addf %47, %48 : vector<1x512xf32>
    %50 = arith.mulf %49, %20 : vector<1x512xf32>
    %51 = math.tanh %50 : vector<1x512xf32>
    %52 = arith.mulf %51, %20 : vector<1x512xf32>
    %53 = arith.addf %52, %23 : vector<1x512xf32>
    %54 = vector.extract_strided_slice %53 {offsets = [0, 0], sizes = [1, 128], strides = [1, 1]} : vector<1x512xf32> to vector<1x128xf32>
    %55 = vector.extract_strided_slice %53 {offsets = [0, 128], sizes = [1, 128], strides = [1, 1]} : vector<1x512xf32> to vector<1x128xf32>
    %56 = vector.extract_strided_slice %53 {offsets = [0, 256], sizes = [1, 128], strides = [1, 1]} : vector<1x512xf32> to vector<1x128xf32>
    %57 = vector.extract_strided_slice %53 {offsets = [0, 384], sizes = [1, 128], strides = [1, 1]} : vector<1x512xf32> to vector<1x128xf32>
    %58 = arith.mulf %55, %41 : vector<1x128xf32>
    %59 = arith.mulf %54, %57 : vector<1x128xf32>
    %60 = arith.addf %58, %59 : vector<1x128xf32>
    %61 = math.tanh %60 : vector<1x128xf32>
    %62 = arith.mulf %56, %61 : vector<1x128xf32>
    %63 = arith.index_cast %c1_i32 : i32 to index
    %c0_23 = arith.constant 0 : index
    %64 = vector.load %arg9[%63, %c0_23] : memref<8x128xf32, #tpu.memory_space<vmem>>, vector<1x128xf32>
    tpu.vector_store %arg9[%63, %c0_23], %62 {strides = array<i32>} : memref<8x128xf32, #tpu.memory_space<vmem>>, vector<1x128xf32>,
    %c2_i32 = arith.constant 2 : i32
    %65 = arith.index_cast %c2_i32 : i32 to index
    %c0_24 = arith.constant 0 : index
    %66 = vector.load %arg8[%65, %c0_24] : memref<8x512xf32, #tpu.memory_space<vmem>>, vector<1x512xf32>
    %cst_25 = arith.constant dense<0.000000e+00> : vector<1x512xf32>
    %67 = tpu.matmul %62, %24, %cst_25 {dimension_numbers = #tpu.dot_dimension_numbers<[1], [0], [0], [1], [0, 0, 1, 1], [], []>} : vector<1x128xf32>, vector<128x512xf32>, vector<1x512xf32> -> vector<1x512xf32>
    %68 = arith.addf %66, %67 : vector<1x512xf32>
    %69 = arith.mulf %68, %20 : vector<1x512xf32>
    %70 = math.tanh %69 : vector<1x512xf32>
    %71 = arith.mulf %70, %20 : vector<1x512xf32>
    %72 = arith.addf %71, %23 : vector<1x512xf32>
    %73 = vector.extract_strided_slice %72 {offsets = [0, 0], sizes = [1, 128], strides = [1, 1]} : vector<1x512xf32> to vector<1x128xf32>
    %74 = vector.extract_strided_slice %72 {offsets = [0, 128], sizes = [1, 128], strides = [1, 1]} : vector<1x512xf32> to vector<1x128xf32>
    %75 = vector.extract_strided_slice %72 {offsets = [0, 256], sizes = [1, 128], strides = [1, 1]} : vector<1x512xf32> to vector<1x128xf32>
    %76 = vector.extract_strided_slice %72 {offsets = [0, 384], sizes = [1, 128], strides = [1, 1]} : vector<1x512xf32> to vector<1x128xf32>
    %77 = arith.mulf %74, %60 : vector<1x128xf32>
    %78 = arith.mulf %73, %76 : vector<1x128xf32>
    %79 = arith.addf %77, %78 : vector<1x128xf32>
    %80 = math.tanh %79 : vector<1x128xf32>
    %81 = arith.mulf %75, %80 : vector<1x128xf32>
    %82 = arith.index_cast %c2_i32 : i32 to index
    %c0_26 = arith.constant 0 : index
    %83 = vector.load %arg9[%82, %c0_26] : memref<8x128xf32, #tpu.memory_space<vmem>>, vector<1x128xf32>
    tpu.vector_store %arg9[%82, %c0_26], %81 {strides = array<i32>} : memref<8x128xf32, #tpu.memory_space<vmem>>, vector<1x128xf32>,
    %c3_i32 = arith.constant 3 : i32
    %84 = arith.index_cast %c3_i32 : i32 to index
    %c0_27 = arith.constant 0 : index
    %85 = vector.load %arg8[%84, %c0_27] : memref<8x512xf32, #tpu.memory_space<vmem>>, vector<1x512xf32>
    %cst_28 = arith.constant dense<0.000000e+00> : vector<1x512xf32>
    %86 = tpu.matmul %81, %24, %cst_28 {dimension_numbers = #tpu.dot_dimension_numbers<[1], [0], [0], [1], [0, 0, 1, 1], [], []>} : vector<1x128xf32>, vector<128x512xf32>, vector<1x512xf32> -> vector<1x512xf32>
    %87 = arith.addf %85, %86 : vector<1x512xf32>
    %88 = arith.mulf %87, %20 : vector<1x512xf32>
    %89 = math.tanh %88 : vector<1x512xf32>
    %90 = arith.mulf %89, %20 : vector<1x512xf32>
    %91 = arith.addf %90, %23 : vector<1x512xf32>
    %92 = vector.extract_strided_slice %91 {offsets = [0, 0], sizes = [1, 128], strides = [1, 1]} : vector<1x512xf32> to vector<1x128xf32>
    %93 = vector.extract_strided_slice %91 {offsets = [0, 128], sizes = [1, 128], strides = [1, 1]} : vector<1x512xf32> to vector<1x128xf32>
    %94 = vector.extract_strided_slice %91 {offsets = [0, 256], sizes = [1, 128], strides = [1, 1]} : vector<1x512xf32> to vector<1x128xf32>
    %95 = vector.extract_strided_slice %91 {offsets = [0, 384], sizes = [1, 128], strides = [1, 1]} : vector<1x512xf32> to vector<1x128xf32>
    %96 = arith.mulf %93, %79 : vector<1x128xf32>
    %97 = arith.mulf %92, %95 : vector<1x128xf32>
    %98 = arith.addf %96, %97 : vector<1x128xf32>
    %99 = math.tanh %98 : vector<1x128xf32>
    %100 = arith.mulf %94, %99 : vector<1x128xf32>
    %101 = arith.index_cast %c3_i32 : i32 to index
    %c0_29 = arith.constant 0 : index
    %102 = vector.load %arg9[%101, %c0_29] : memref<8x128xf32, #tpu.memory_space<vmem>>, vector<1x128xf32>
    tpu.vector_store %arg9[%101, %c0_29], %100 {strides = array<i32>} : memref<8x128xf32, #tpu.memory_space<vmem>>, vector<1x128xf32>,
    %c4_i32 = arith.constant 4 : i32
    %103 = arith.index_cast %c4_i32 : i32 to index
    %c0_30 = arith.constant 0 : index
    %104 = vector.load %arg8[%103, %c0_30] : memref<8x512xf32, #tpu.memory_space<vmem>>, vector<1x512xf32>
    %cst_31 = arith.constant dense<0.000000e+00> : vector<1x512xf32>
    %105 = tpu.matmul %100, %24, %cst_31 {dimension_numbers = #tpu.dot_dimension_numbers<[1], [0], [0], [1], [0, 0, 1, 1], [], []>} : vector<1x128xf32>, vector<128x512xf32>, vector<1x512xf32> -> vector<1x512xf32>
    %106 = arith.addf %104, %105 : vector<1x512xf32>
    %107 = arith.mulf %106, %20 : vector<1x512xf32>
    %108 = math.tanh %107 : vector<1x512xf32>
    %109 = arith.mulf %108, %20 : vector<1x512xf32>
    %110 = arith.addf %109, %23 : vector<1x512xf32>
    %111 = vector.extract_strided_slice %110 {offsets = [0, 0], sizes = [1, 128], strides = [1, 1]} : vector<1x512xf32> to vector<1x128xf32>
    %112 = vector.extract_strided_slice %110 {offsets = [0, 128], sizes = [1, 128], strides = [1, 1]} : vector<1x512xf32> to vector<1x128xf32>
    %113 = vector.extract_strided_slice %110 {offsets = [0, 256], sizes = [1, 128], strides = [1, 1]} : vector<1x512xf32> to vector<1x128xf32>
    %114 = vector.extract_strided_slice %110 {offsets = [0, 384], sizes = [1, 128], strides = [1, 1]} : vector<1x512xf32> to vector<1x128xf32>
    %115 = arith.mulf %112, %98 : vector<1x128xf32>
    %116 = arith.mulf %111, %114 : vector<1x128xf32>
    %117 = arith.addf %115, %116 : vector<1x128xf32>
    %118 = math.tanh %117 : vector<1x128xf32>
    %119 = arith.mulf %113, %118 : vector<1x128xf32>
    %120 = arith.index_cast %c4_i32 : i32 to index
    %c0_32 = arith.constant 0 : index
    %121 = vector.load %arg9[%120, %c0_32] : memref<8x128xf32, #tpu.memory_space<vmem>>, vector<1x128xf32>
    tpu.vector_store %arg9[%120, %c0_32], %119 {strides = array<i32>} : memref<8x128xf32, #tpu.memory_space<vmem>>, vector<1x128xf32>,
    %c5_i32 = arith.constant 5 : i32
    %122 = arith.index_cast %c5_i32 : i32 to index
    %c0_33 = arith.constant 0 : index
    %123 = vector.load %arg8[%122, %c0_33] : memref<8x512xf32, #tpu.memory_space<vmem>>, vector<1x512xf32>
    %cst_34 = arith.constant dense<0.000000e+00> : vector<1x512xf32>
    %124 = tpu.matmul %119, %24, %cst_34 {dimension_numbers = #tpu.dot_dimension_numbers<[1], [0], [0], [1], [0, 0, 1, 1], [], []>} : vector<1x128xf32>, vector<128x512xf32>, vector<1x512xf32> -> vector<1x512xf32>
    %125 = arith.addf %123, %124 : vector<1x512xf32>
    %126 = arith.mulf %125, %20 : vector<1x512xf32>
    %127 = math.tanh %126 : vector<1x512xf32>
    %128 = arith.mulf %127, %20 : vector<1x512xf32>
    %129 = arith.addf %128, %23 : vector<1x512xf32>
    %130 = vector.extract_strided_slice %129 {offsets = [0, 0], sizes = [1, 128], strides = [1, 1]} : vector<1x512xf32> to vector<1x128xf32>
    %131 = vector.extract_strided_slice %129 {offsets = [0, 128], sizes = [1, 128], strides = [1, 1]} : vector<1x512xf32> to vector<1x128xf32>
    %132 = vector.extract_strided_slice %129 {offsets = [0, 256], sizes = [1, 128], strides = [1, 1]} : vector<1x512xf32> to vector<1x128xf32>
    %133 = vector.extract_strided_slice %129 {offsets = [0, 384], sizes = [1, 128], strides = [1, 1]} : vector<1x512xf32> to vector<1x128xf32>
    %134 = arith.mulf %131, %117 : vector<1x128xf32>
    %135 = arith.mulf %130, %133 : vector<1x128xf32>
    %136 = arith.addf %134, %135 : vector<1x128xf32>
    %137 = math.tanh %136 : vector<1x128xf32>
    %138 = arith.mulf %132, %137 : vector<1x128xf32>
    %139 = arith.index_cast %c5_i32 : i32 to index
    %c0_35 = arith.constant 0 : index
    %140 = vector.load %arg9[%139, %c0_35] : memref<8x128xf32, #tpu.memory_space<vmem>>, vector<1x128xf32>
    tpu.vector_store %arg9[%139, %c0_35], %138 {strides = array<i32>} : memref<8x128xf32, #tpu.memory_space<vmem>>, vector<1x128xf32>,
    %c6_i32 = arith.constant 6 : i32
    %141 = arith.index_cast %c6_i32 : i32 to index
    %c0_36 = arith.constant 0 : index
    %142 = vector.load %arg8[%141, %c0_36] : memref<8x512xf32, #tpu.memory_space<vmem>>, vector<1x512xf32>
    %cst_37 = arith.constant dense<0.000000e+00> : vector<1x512xf32>
    %143 = tpu.matmul %138, %24, %cst_37 {dimension_numbers = #tpu.dot_dimension_numbers<[1], [0], [0], [1], [0, 0, 1, 1], [], []>} : vector<1x128xf32>, vector<128x512xf32>, vector<1x512xf32> -> vector<1x512xf32>
    %144 = arith.addf %142, %143 : vector<1x512xf32>
    %145 = arith.mulf %144, %20 : vector<1x512xf32>
    %146 = math.tanh %145 : vector<1x512xf32>
    %147 = arith.mulf %146, %20 : vector<1x512xf32>
    %148 = arith.addf %147, %23 : vector<1x512xf32>
    %149 = vector.extract_strided_slice %148 {offsets = [0, 0], sizes = [1, 128], strides = [1, 1]} : vector<1x512xf32> to vector<1x128xf32>
    %150 = vector.extract_strided_slice %148 {offsets = [0, 128], sizes = [1, 128], strides = [1, 1]} : vector<1x512xf32> to vector<1x128xf32>
    %151 = vector.extract_strided_slice %148 {offsets = [0, 256], sizes = [1, 128], strides = [1, 1]} : vector<1x512xf32> to vector<1x128xf32>
    %152 = vector.extract_strided_slice %148 {offsets = [0, 384], sizes = [1, 128], strides = [1, 1]} : vector<1x512xf32> to vector<1x128xf32>
    %153 = arith.mulf %150, %136 : vector<1x128xf32>
    %154 = arith.mulf %149, %152 : vector<1x128xf32>
    %155 = arith.addf %153, %154 : vector<1x128xf32>
    %156 = math.tanh %155 : vector<1x128xf32>
    %157 = arith.mulf %151, %156 : vector<1x128xf32>
    %158 = arith.index_cast %c6_i32 : i32 to index
    %c0_38 = arith.constant 0 : index
    %159 = vector.load %arg9[%158, %c0_38] : memref<8x128xf32, #tpu.memory_space<vmem>>, vector<1x128xf32>
    tpu.vector_store %arg9[%158, %c0_38], %157 {strides = array<i32>} : memref<8x128xf32, #tpu.memory_space<vmem>>, vector<1x128xf32>,
    %c7_i32 = arith.constant 7 : i32
    %160 = arith.index_cast %c7_i32 : i32 to index
    %c0_39 = arith.constant 0 : index
    %161 = vector.load %arg8[%160, %c0_39] : memref<8x512xf32, #tpu.memory_space<vmem>>, vector<1x512xf32>
    %cst_40 = arith.constant dense<0.000000e+00> : vector<1x512xf32>
    %162 = tpu.matmul %157, %24, %cst_40 {dimension_numbers = #tpu.dot_dimension_numbers<[1], [0], [0], [1], [0, 0, 1, 1], [], []>} : vector<1x128xf32>, vector<128x512xf32>, vector<1x512xf32> -> vector<1x512xf32>
    %163 = arith.addf %161, %162 : vector<1x512xf32>
    %164 = arith.mulf %163, %20 : vector<1x512xf32>
    %165 = math.tanh %164 : vector<1x512xf32>
    %166 = arith.mulf %165, %20 : vector<1x512xf32>
    %167 = arith.addf %166, %23 : vector<1x512xf32>
    %168 = vector.extract_strided_slice %167 {offsets = [0, 0], sizes = [1, 128], strides = [1, 1]} : vector<1x512xf32> to vector<1x128xf32>
    %169 = vector.extract_strided_slice %167 {offsets = [0, 128], sizes = [1, 128], strides = [1, 1]} : vector<1x512xf32> to vector<1x128xf32>
    %170 = vector.extract_strided_slice %167 {offsets = [0, 256], sizes = [1, 128], strides = [1, 1]} : vector<1x512xf32> to vector<1x128xf32>
    %171 = vector.extract_strided_slice %167 {offsets = [0, 384], sizes = [1, 128], strides = [1, 1]} : vector<1x512xf32> to vector<1x128xf32>
    %172 = arith.mulf %169, %155 : vector<1x128xf32>
    %173 = arith.mulf %168, %171 : vector<1x128xf32>
    %174 = arith.addf %172, %173 : vector<1x128xf32>
    %175 = math.tanh %174 : vector<1x128xf32>
    %176 = arith.mulf %170, %175 : vector<1x128xf32>
    %177 = arith.index_cast %c7_i32 : i32 to index
    %c0_41 = arith.constant 0 : index
    %178 = vector.load %arg9[%177, %c0_41] : memref<8x128xf32, #tpu.memory_space<vmem>>, vector<1x128xf32>
    tpu.vector_store %arg9[%177, %c0_41], %176 {strides = array<i32>} : memref<8x128xf32, #tpu.memory_space<vmem>>, vector<1x128xf32>,
    %c8_i32 = arith.constant 8 : i32
    %c0_42 = arith.constant 0 : index
    %c0_43 = arith.constant 0 : index
    %179 = vector.load %arg10[%c0_42, %c0_43] : memref<1x128xf32, #tpu.memory_space<vmem>>, vector<1x128xf32>
    tpu.vector_store %arg10[%c0_42, %c0_43], %176 {strides = array<i32>} : memref<1x128xf32, #tpu.memory_space<vmem>>, vector<1x128xf32>,
    %c0_44 = arith.constant 0 : index
    %c0_45 = arith.constant 0 : index
    %180 = vector.load %arg11[%c0_44, %c0_45] : memref<1x128xf32, #tpu.memory_space<vmem>>, vector<1x128xf32>
    tpu.vector_store %arg11[%c0_44, %c0_45], %174 {strides = array<i32>} : memref<1x128xf32, #tpu.memory_space<vmem>>, vector<1x128xf32>,
    %c0_46 = arith.constant 0 : index
    %c0_47 = arith.constant 0 : index
    %181 = vector.load %arg9[%c0_46, %c0_47] : memref<8x128xf32, #tpu.memory_space<vmem>>, vector<8x128xf32>
    %c0_48 = arith.constant 0 : index
    %c0_49 = arith.constant 0 : index
    %182 = vector.load %arg5[%c0_48, %c0_49] : memref<128x128xf32, #tpu.memory_space<vmem>>, vector<128x128xf32>
    %cst_50 = arith.constant dense<0.000000e+00> : vector<8x128xf32>
    %183 = tpu.matmul %181, %182, %cst_50 {dimension_numbers = #tpu.dot_dimension_numbers<[1], [0], [0], [1], [0, 0, 1, 1], [], []>} : vector<8x128xf32>, vector<128x128xf32>, vector<8x128xf32> -> vector<8x128xf32>
    %c0_51 = arith.constant 0 : index
    %c0_52 = arith.constant 0 : index
    %184 = vector.load %arg6[%c0_51, %c0_52] : memref<1x128xf32, #tpu.memory_space<vmem>>, vector<1x128xf32>
    %185 = vector.broadcast %184 : vector<1x128xf32> to vector<8x128xf32>
    %186 = arith.addf %183, %185 : vector<8x128xf32>
    %c0_53 = arith.constant 0 : index
    %c0_54 = arith.constant 0 : index
    %187 = vector.load %arg7[%c0_53, %c0_54] : memref<8x128xf32, #tpu.memory_space<vmem>>, vector<8x128xf32>
    tpu.vector_store %arg7[%c0_53, %c0_54], %186 {strides = array<i32>} : memref<8x128xf32, #tpu.memory_space<vmem>>, vector<8x128xf32>,
    return
  }
  func.func @transform_0(%arg0: i32) -> (i32, i32) {
    %c0_i32 = arith.constant 0 : i32
    %c0_i32_0 = arith.constant 0 : i32
    return %arg0, %c0_i32 : i32, i32
  }
  func.func @transform_1(%arg0: i32) -> (i32, i32) {
    %c0_i32 = arith.constant 0 : i32
    %c0_i32_0 = arith.constant 0 : i32
    %c0_i32_1 = arith.constant 0 : i32
    return %c0_i32, %c0_i32_0 : i32, i32
  }
  func.func @transform_2(%arg0: i32) -> (i32, i32) {
    %c0_i32 = arith.constant 0 : i32
    %c0_i32_0 = arith.constant 0 : i32
    %c0_i32_1 = arith.constant 0 : i32
    return %c0_i32, %c0_i32_0 : i32, i32
  }
  func.func @transform_3(%arg0: i32) -> (i32, i32) {
    %c0_i32 = arith.constant 0 : i32
    %c0_i32_0 = arith.constant 0 : i32
    %c0_i32_1 = arith.constant 0 : i32
    return %c0_i32, %c0_i32_0 : i32, i32
  }
  func.func @transform_4(%arg0: i32) -> (i32, i32) {
    %c0_i32 = arith.constant 0 : i32
    %c0_i32_0 = arith.constant 0 : i32
    %c0_i32_1 = arith.constant 0 : i32
    return %c0_i32, %c0_i32_0 : i32, i32
  }
  func.func @transform_5(%arg0: i32) -> (i32, i32) {
    %c0_i32 = arith.constant 0 : i32
    %c0_i32_0 = arith.constant 0 : i32
    %c0_i32_1 = arith.constant 0 : i32
    return %c0_i32, %c0_i32_0 : i32, i32
  }
  func.func @transform_6(%arg0: i32) -> (i32, i32) {
    %c0_i32 = arith.constant 0 : i32
    %c0_i32_0 = arith.constant 0 : i32
    return %arg0, %c0_i32 : i32, i32
  }
}

</mosaic_0001>

<bundles_post_ra>
// kernel: tpu_custom_call.1
= control target key start
LH: loop header
LB: loop body
LE: loop exit
PB: predicated region body
PF: predicated region fallthrough
CT: control target
= control target key end

     0   :  { %11 = vsyncpa [#allocation7], 0  ;;  %s3308_s0 = inlined_call_operand.hbm [shape: f32[8,1], index: 0, kind: input, shape index: {}]   ;;  %s3309_s1 = inlined_call_operand.hbm [shape: f32[1,512], index: 1, kind: input, shape index: {}]   ;;  %s3310_s2 = inlined_call_operand.hbm [shape: f32[128,512], index: 2, kind: input, shape index: {}]   ;;  %s3311_s3 = inlined_call_operand.hbm [shape: f32[1,512], index: 3, kind: input, shape index: {}]   ;;  %s3312_s4 = inlined_call_operand.hbm [shape: f32[128,128], index: 4, kind: input, shape index: {}]   ;;  %s3313_s5 = inlined_call_operand.hbm [shape: f32[1,128], index: 5, kind: input, shape index: {}]   ;;  %s3314_s6 = inlined_call_operand.hbm [shape: f32[8,128], index: 6, kind: output, shape index: {}]  }
   0x1   :  { %12 = vsyncpa [#allocation10], 0 }
   0x2   :  { %13 = vsyncpa [#allocation13], 0 }
   0x3   :  { %14 = vsyncpa [#allocation16], 0 }
   0x4   :  { %15 = vsyncpa [#allocation8], 0  ;;  %s2761_s21 = smov [#allocation9]   ;;  %s2762_s23 = smov [#allocation12]  }
   0x5   :  { %s32_s22 = sshll.u32 %s2761_s21, 4  ;;  %s54_s24 = sshll.u32 %s2762_s23, 4  ;;  %s33_s22 = int_to_ptr.vmem [resolvable:$true] %s32_s22  ;;  %s55_s24 = int_to_ptr.vmem [resolvable:$true] %s54_s24 }
   0x6   :  { %s2597_s27 = scalar_lea.hbm %s3309_s1, 64 }
   0x7   :  { %p2598_p0 = scmp.ne.s32.totalorder %s3309_s1, %s2597_s27  ;;  %p2601_p1 = scmp.lt.u32.totalorder %s2597_s27, %s3309_s1 }
   0x9   :  { %p2603_p2 = pnand %p2601_p1, %p2598_p0 }
   0xb   :  { %2606 = shalt.err (!%p2603_p2)
}
   0xc   :  { %s2607_s8 = scalar_lea.vmem %s33_s22, 64  ;;  %p2612_p4 = scmp.lt.s32.totalorder %s33_s22, %s33_s22 }
   0xd   :  { %p2608_p3 = scmp.ne.s32.totalorder %s33_s22, %s2607_s8  ;;  %p2613_p5 = scmp.lt.s32.totalorder %s2607_s8, %s2607_s8 }
   0xf   :  { %p2614_p6 = por %p2613_p5, %p2612_p4 }
  0x11   :  { %p2615_p7 = pnand %p2614_p6, %p2608_p3 }
  0x13   :  { %2618 = shalt.err (!%p2615_p7)
}
  0x14   :  { %35 = dma.hbm_to_vmem [thread:$0]  %s3309_s1, 64, %s33_s22, [#allocation10]  }
  0x15   :  { %s2619_s13 = scalar_lea.hbm %s3311_s3, 64 }
  0x16   :  { %p2620_p8 = scmp.ne.s32.totalorder %s3311_s3, %s2619_s13  ;;  %p2623_p9 = scmp.lt.u32.totalorder %s2619_s13, %s3311_s3 }
  0x18   :  { %p2625_p10 = pnand %p2623_p9, %p2620_p8 }
  0x1a   :  { %2628 = shalt.err (!%p2625_p10)
}
  0x1b   :  { %s2629_s18 = scalar_lea.vmem %s55_s24, 64  ;;  %p2634_p12 = scmp.lt.s32.totalorder %s55_s24, %s55_s24 }
  0x1c   :  { %p2630_p11 = scmp.ne.s32.totalorder %s55_s24, %s2629_s18  ;;  %p2635_p13 = scmp.lt.s32.totalorder %s2629_s18, %s2629_s18 }
  0x1e   :  { %p2636_p0 = por %p2635_p13, %p2634_p12 }
  0x20   :  { %p2637_p1 = pnand %p2636_p0, %p2630_p11 }
  0x22   :  { %2640 = shalt.err (!%p2637_p1)
}
  0x23   :  { %57 = dma.hbm_to_vmem [thread:$0]  %s3311_s3, 64, %s55_s24, [#allocation13]  }
  0x24   :  { %s2763_s20 = smov [#allocation6]   ;;  %s2764_s22 = smov [#allocation11]  }
  0x25   :  { %s22_s21 = sshll.u32 %s2763_s20, 4  ;;  %s41_s23 = sshll.u32 %s2764_s22, 4  ;;  %s23_s21 = int_to_ptr.vmem [resolvable:$true] %s22_s21  ;;  %s2838_s23 = int_to_ptr.vmem [resolvable:$true] %s41_s23 }
  0x26   :  { %s2641_s27 = scalar_lea.hbm %s3308_s0, 128 }
  0x27   :  { %p2642_p2 = scmp.ne.s32.totalorder %s3308_s0, %s2641_s27  ;;  %p2645_p3 = scmp.lt.u32.totalorder %s2641_s27, %s3308_s0 }
  0x29   :  { %p2647_p4 = pnand %p2645_p3, %p2642_p2 }
  0x2b   :  { %2650 = shalt.err (!%p2647_p4)
}
  0x2c   :  { %s2651_s3 = scalar_lea.vmem %s23_s21, 128  ;;  %p2656_p6 = scmp.lt.s32.totalorder %s23_s21, %s23_s21 }
  0x2d   :  { %p2652_p5 = scmp.ne.s32.totalorder %s23_s21, %s2651_s3  ;;  %p2657_p7 = scmp.lt.s32.totalorder %s2651_s3, %s2651_s3 }
  0x2f   :  { %p2658_p8 = por %p2657_p7, %p2656_p6 }
  0x31   :  { %p2659_p9 = pnand %p2658_p8, %p2652_p5 }
  0x33   :  { %2662 = shalt.err (!%p2659_p9)
}
  0x34   :  { %25 = dma.hbm_to_vmem [thread:$0]  %s3308_s0, 128, %s23_s21, [#allocation7]  }
  0x35   :  { %s2663_s11 = scalar_lea.hbm %s3310_s2, 8192 }
  0x36   :  { %p2664_p10 = scmp.ne.s32.totalorder %s3310_s2, %s2663_s11  ;;  %p2667_p11 = scmp.lt.u32.totalorder %s2663_s11, %s3310_s2 }
  0x38   :  { %p2669_p12 = pnand %p2667_p11, %p2664_p10 }
  0x3a   :  { %2672 = shalt.err (!%p2669_p12)
}
  0x3b   :  { %s2673_s16 = scalar_lea.vmem %s2838_s23, 8192  ;;  %p2678_p0 = scmp.lt.s32.totalorder %s2838_s23, %s2838_s23 }
  0x3c   :  { %p2674_p13 = scmp.ne.s32.totalorder %s2838_s23, %s2673_s16  ;;  %p2679_p1 = scmp.lt.s32.totalorder %s2673_s16, %s2673_s16 }
  0x3e   :  { %p2680_p2 = por %p2679_p1, %p2678_p0 }
  0x40   :  { %p2681_p3 = pnand %p2680_p2, %p2674_p13 }
  0x42   :  { %2684 = shalt.err (!%p2681_p3)
}
  0x43   :  { %s2765_s0 = smov 512   ;;  %s2766_s17 = smov 32  }
  0x44   :  { %47 = dma.hbm_to_vmem [thread:$0]  %s3310_s2, 8192, %s2838_s23, [#allocation10], %s2765_s0, %s2765_s0, %s2766_s17  }
  0x45   :  { %s2767_s19 = smov [#allocation14]   ;;  %s2685_s25 = scalar_lea.hbm %s3312_s4, 2048 }
  0x46   :  { %s63_s20 = sshll.u32 %s2767_s19, 4  ;;  %p2686_p4 = scmp.ne.s32.totalorder %s3312_s4, %s2685_s25  ;;  %s64_s20 = int_to_ptr.vmem [resolvable:$true] %s63_s20 }
  0x47   :  { %p2689_p5 = scmp.lt.u32.totalorder %s2685_s25, %s3312_s4 }
  0x49   :  { %p2691_p6 = pnand %p2689_p5, %p2686_p4 }
  0x4b   :  { %2694 = shalt.err (!%p2691_p6)
}
  0x4c   :  { %s2695_s30 = scalar_lea.vmem %s64_s20, 2048  ;;  %p2700_p8 = scmp.lt.s32.totalorder %s64_s20, %s64_s20 }
  0x4d   :  { %p2696_p7 = scmp.ne.s32.totalorder %s64_s20, %s2695_s30  ;;  %p2701_p9 = scmp.lt.s32.totalorder %s2695_s30, %s2695_s30 }
  0x4f   :  { %p2702_p10 = por %p2701_p9, %p2700_p8 }
  0x51   :  { %p2703_p11 = pnand %p2702_p10, %p2696_p7 }
  0x53   :  { %2706 = shalt.err (!%p2703_p11)
}
  0x54   :  { %s2768_s2 = smov 128   ;;  %s2769_s23 = smov 8  }
  0x55   :  { %69 = dma.hbm_to_vmem [thread:$0]  %s3312_s4, 2048, %s64_s20, [#allocation13], %s2768_s2, %s2768_s2, %s2769_s23  }
  0x56   :  { %s2770_s24 = smov [#allocation15]   ;;  %s2707_s11 = scalar_lea.hbm %s3313_s5, 16 }
  0x57   :  { %s76_s8 = sshll.u32 %s2770_s24, 4  ;;  %p2708_p12 = scmp.ne.s32.totalorder %s3313_s5, %s2707_s11  ;;  %s77_s8 = int_to_ptr.vmem [resolvable:$true] %s76_s8 }
  0x58   :  { %p2711_p13 = scmp.lt.u32.totalorder %s2707_s11, %s3313_s5 }
  0x5a   :  { %p2713_p0 = pnand %p2711_p13, %p2708_p12 }
  0x5c   :  { %2716 = shalt.err (!%p2713_p0)
}
  0x5d   :  { %s2717_s16 = scalar_lea.vmem %s77_s8, 16  ;;  %s2721_s4 = scalar_lea.vmem %s77_s8, 32 }
  0x5e   :  { %p2718_p1 = scmp.ne.s32.totalorder %s77_s8, %s2717_s16  ;;  %p2722_p2 = scmp.lt.s32.totalorder %s77_s8, %s77_s8 }
  0x5f   :  { %p2723_p3 = scmp.lt.s32.totalorder %s2721_s4, %s2717_s16 }
  0x61   :  { %p2724_p4 = por %p2723_p3, %p2722_p2 }
  0x63   :  { %p2725_p5 = pnand %p2724_p4, %p2718_p1 }
  0x65   :  { %2728 = shalt.err (!%p2725_p5)
}
  0x66   :  { %79 = dma.hbm_to_vmem [thread:$0]  %s3313_s5, 16, %s77_s8, [#allocation16]  }
  0x67   :  { %2751 = dma.done.wait [#allocation7], 128  }
  0x68   :  { %2752 = vsyncadd [#allocation7], 4294967168 }
  0x69   :  { %2753 = dma.done.wait [#allocation10], 8256  }
  0x6a   :  { %2754 = vsyncadd [#allocation10], 4294959040 }
  0x6b   :  { %2755 = dma.done.wait [#allocation13], 2112  }
  0x6c   :  { %2756 = vsyncadd [#allocation13], 4294965184 }
  0x6d   :  { %2757 = dma.done.wait [#allocation16], 16  }
  0x6e   :  { %2758 = vsyncadd [#allocation16], 4294967280  ;;  %v2771_v0 = vmov 0.0   ;;  %v2772_v1 = vmov 0   ;;  %v192_v2 = vld [vmem:[#allocation11 + $0x8] sm:$0xff]  ;;  %v194_v4 = vld [vmem:[#allocation11 + $0x18] sm:$0xff] }
  0x6f   :  { %322 = vmatprep.mubr.f32.mxu0 %v2771_v0  ;;  %102 = vst [vmem:[#allocation4] sm:$0x1] %v2771_v0  ;;  %103 = vst [vmem:[#allocation5] sm:$0x1] %v2771_v0  ;;  %393 = vmatprep.mubr.f32.mxu1 %v2771_v0  ;;  %v196_v3 = vld [vmem:[#allocation11 + $0x28] sm:$0xff]  ;;  %v198_v6 = vld [vmem:[#allocation11 + $0x38] sm:$0xff] }
  0x70   :  { %2564 = vset.pattern.permute.xlu0 %v2772_v1  ;;  %v2897_v5 = vpack.c.bf16 %v196_v3, %v192_v2  ;;  %v191_v7 = vld [vmem:[#allocation11] sm:$0xff]  ;;  %v2899_v9 = vpack.c.bf16 %v198_v6, %v194_v4  ;;  %v193_v11 = vld [vmem:[#allocation11 + $0x10] sm:$0xff]  ;;  %v200_v13 = vld [vmem:[#allocation11 + $0x48] sm:$0xff]  ;;  %vm2777_vm0 = vmmov 0   ;;  %s2778_s5 = smov [#allocation17]  }
  0x71   :  { %v195_v8 = vld [vmem:[#allocation11 + $0x20] sm:$0xff]  ;;  %v197_v12 = vld [vmem:[#allocation11 + $0x30] sm:$0xff]  ;;  %v204_v15 = vld [vmem:[#allocation11 + $0x68] sm:$0xff]  ;;  %s1945_s18 = sshll.u32 %s2778_s5, 4  ;;  %s1946_s18 = int_to_ptr.vmem [resolvable:$true] %s1945_s18 }
  0x72   :  { %v2901_v10 = vpack.c.bf16 %v195_v8, %v191_v7  ;;  %2011 = vmatprep.subr.bf16.mxu0 %v2897_v5  ;;  %v2904_v14 = vpack.c.bf16 %v197_v12, %v193_v11  ;;  %v202_v16 = vld [vmem:[#allocation11 + $0x58] sm:$0xff]  ;;  %2043 = vmatprep.subr.bf16.mxu1 %v2899_v9  ;;  %v2908_v18 = vpack.c.bf16 %v204_v15, %v200_v13  ;;  %v199_v20 = vld [vmem:[#allocation11 + $0x40] sm:$0xff]  ;;  %v201_v22 = vld [vmem:[#allocation11 + $0x50] sm:$0xff]  ;;  %s2729_s1 = scalar_lea.vmem %s1946_s18, 128  ;;  %p2734_p7 = scmp.lt.s32.totalorder %s1946_s18, %s1946_s18 }
  0x73   :  { %v206_v17 = vld [vmem:[#allocation11 + $0x78] sm:$0xff]  ;;  %v203_v21 = vld [vmem:[#allocation11 + $0x60] sm:$0xff]  ;;  %v205_v24 = vld [vmem:[#allocation11 + $0x70] sm:$0xff]  ;;  %p2730_p6 = scmp.ne.s32.totalorder %s1946_s18, %s2729_s1  ;;  %p2735_p8 = scmp.lt.s32.totalorder %s2729_s1, %s2729_s1 }
  0x74   :  { %2013 = vmatpush1.bf16.msra.mxu0 %v2901_v10  ;;  %v2910_v19 = vpack.c.bf16 %v206_v17, %v202_v16  ;;  %2045 = vmatpush1.bf16.msra.mxu1 %v2904_v14  ;;  %v2913_v23 = vpack.c.bf16 %v203_v21, %v199_v20  ;;  %v208_v25 = vld [vmem:[#allocation11 + $0x88] sm:$0xff]  ;;  %v2917_v27 = vpack.c.bf16 %v205_v24, %v201_v22  ;;  %v210_v29 = vld [vmem:[#allocation11 + $0x98] sm:$0xff]  ;;  %v207_v31 = vld [vmem:[#allocation11 + $0x80] sm:$0xff] }
  0x75   :  { %v212_v26 = vld [vmem:[#allocation11 + $0xa8] sm:$0xff]  ;;  %2015 = vmatprep.subr.bf16.mxu0 %v2908_v18  ;;  %v214_v30 = vld [vmem:[#allocation11 + $0xb8] sm:$0xff]  ;;  %v211_v33 = vld [vmem:[#allocation11 + $0xa0] sm:$0xff]  ;;  %p2736_p9 = por %p2735_p8, %p2734_p7 }
  0x76   :  { %2047 = vmatprep.subr.bf16.mxu1 %v2910_v19  ;;  %v2919_v28 = vpack.c.bf16 %v212_v26, %v208_v25  ;;  %v2921_v32 = vpack.c.bf16 %v214_v30, %v210_v29  ;;  %v209_v34 = vld [vmem:[#allocation11 + $0x90] sm:$0xff]  ;;  %v2924_v36 = vpack.c.bf16 %v211_v33, %v207_v31  ;;  %v216_v37 = vld [vmem:[#allocation11 + $0xc8] sm:$0xff]  ;;  %v218_v39 = vld [vmem:[#allocation11 + $0xd8] sm:$0xff] }
  0x77   :  { %v213_v35 = vld [vmem:[#allocation11 + $0xb0] sm:$0xff]  ;;  %v220_v38 = vld [vmem:[#allocation11 + $0xe8] sm:$0xff]  ;;  %v222_v42 = vld [vmem:[#allocation11 + $0xf8] sm:$0xff]  ;;  %p2737_p10 = pnand %p2736_p9, %p2730_p6 }
  0x78   :  { %2017 = vmatpush1.bf16.msra.mxu0 %v2913_v23  ;;  %2049 = vmatpush1.bf16.msra.mxu1 %v2917_v27  ;;  %v2928_v40 = vpack.c.bf16 %v213_v35, %v209_v34  ;;  %v2930_v41 = vpack.c.bf16 %v220_v38, %v216_v37  ;;  %v215_v43 = vld [vmem:[#allocation11 + $0xc0] sm:$0xff]  ;;  %v2933_v45 = vpack.c.bf16 %v222_v42, %v218_v39  ;;  %v217_v46 = vld [vmem:[#allocation11 + $0xd0] sm:$0xff]  ;;  %v224_v48 = vld [vmem:[#allocation11 + $0x108] sm:$0xff] }
  0x79   :  { %2019 = vmatprep.subr.bf16.mxu0 %v2919_v28  ;;  %v219_v44 = vld [vmem:[#allocation11 + $0xe0] sm:$0xff]  ;;  %2051 = vmatprep.subr.bf16.mxu1 %v2921_v32  ;;  %v221_v47 = vld [vmem:[#allocation11 + $0xf0] sm:$0xff]  ;;  %v228_v49 = vld [vmem:[#allocation11 + $0x128] sm:$0xff] }
  0x7a   :  { %v226_v50 = vld [vmem:[#allocation11 + $0x118] sm:$0xff]  ;;  %v2936_v52 = vpack.c.bf16 %v219_v44, %v215_v43  ;;  %v2940_v53 = vpack.c.bf16 %v221_v47, %v217_v46  ;;  %v2942_v54 = vpack.c.bf16 %v228_v49, %v224_v48  ;;  %v223_v55 = vld [vmem:[#allocation11 + $0x100] sm:$0xff]  ;;  %v225_v57 = vld [vmem:[#allocation11 + $0x110] sm:$0xff] }
  0x7b   :  { %v230_v51 = vld [vmem:[#allocation11 + $0x138] sm:$0xff]  ;;  %v227_v56 = vld [vmem:[#allocation11 + $0x120] sm:$0xff]  ;;  %v229_v59 = vld [vmem:[#allocation11 + $0x130] sm:$0xff] }
  0x7c   :  { %2021 = vmatpush1.bf16.msra.mxu0 %v2924_v36  ;;  %2053 = vmatpush1.bf16.msra.mxu1 %v2928_v40  ;;  %v2945_v58 = vpack.c.bf16 %v230_v51, %v226_v50  ;;  %v232_v60 = vld [vmem:[#allocation11 + $0x148] sm:$0xff]  ;;  %v234_v62 = vld [vmem:[#allocation11 + $0x158] sm:$0xff]  ;;  %v2948_v1 = vpack.c.bf16 %v227_v56, %v223_v55  ;;  %v2952_v2 = vpack.c.bf16 %v229_v59, %v225_v57  ;;  %v231_v4 = vld [vmem:[#allocation11 + $0x140] sm:$0xff]  ;;  %v112_v51 = vlaneseq }
  0x7d   :  { %2023 = vmatprep.subr.bf16.mxu0 %v2930_v41  ;;  %2055 = vmatprep.subr.bf16.mxu1 %v2933_v45  ;;  %v236_v61 = vld [vmem:[#allocation11 + $0x168] sm:$0xff]  ;;  %v238_v63 = vld [vmem:[#allocation11 + $0x178] sm:$0xff]  ;;  %v235_v6 = vld [vmem:[#allocation11 + $0x160] sm:$0xff] }
  0x7e   :  { %v2954_v3 = vpack.c.bf16 %v236_v61, %v232_v60  ;;  %v233_v7 = vld [vmem:[#allocation11 + $0x150] sm:$0xff]  ;;  %v2957_v8 = vpack.c.bf16 %v238_v63, %v234_v62  ;;  %v240_v12 = vld [vmem:[#allocation11 + $0x188] sm:$0xff]  ;;  %v242_v15 = vld [vmem:[#allocation11 + $0x198] sm:$0xff]  ;;  %v2960_v17 = vpack.c.bf16 %v235_v6, %v231_v4  ;;  %v113_v55 = vshrl.u32 %v112_v51, 7 }
  0x7f   :  { %v237_v11 = vld [vmem:[#allocation11 + $0x170] sm:$0xff]  ;;  %v244_v13 = vld [vmem:[#allocation11 + $0x1a8] sm:$0xff]  ;;  %v246_v16 = vld [vmem:[#allocation11 + $0x1b8] sm:$0xff] }
  0x80   :  { %2025 = vmatpush1.bf16.msra.mxu0 %v2936_v52  ;;  %2057 = vmatpush1.bf16.msra.mxu1 %v2940_v53  ;;  %v239_v20 = vld [vmem:[#allocation11 + $0x180] sm:$0xff]  ;;  %v2964_v21 = vpack.c.bf16 %v237_v11, %v233_v7  ;;  %v2966_v22 = vpack.c.bf16 %v244_v13, %v240_v12  ;;  %v241_v25 = vld [vmem:[#allocation11 + $0x190] sm:$0xff]  ;;  %v2969_v29 = vpack.c.bf16 %v246_v16, %v242_v15  ;;  %v248_v31 = vld [vmem:[#allocation11 + $0x1c8] sm:$0xff]  ;;  %v114_v56 = vsub.s32 0, %v113_v55 }
  0x81   :  { %2027 = vmatprep.subr.bf16.mxu0 %v2942_v54  ;;  %2059 = vmatprep.subr.bf16.mxu1 %v2945_v58  ;;  %v243_v24 = vld [vmem:[#allocation11 + $0x1a0] sm:$0xff]  ;;  %v104_v26 = vld [vmem:[#allocation6] sm:$0xff]  ;;  %v252_v33 = vld [vmem:[#allocation11 + $0x1e8] sm:$0xff]  ;;  %v118_v57 = vsub.s32 1, %v113_v55  ;;  %v122_v59 = vsub.s32 2, %v113_v55  ;;  %v126_v60 = vsub.s32 3, %v113_v55 }
  0x82   :  { %v245_v30 = vld [vmem:[#allocation11 + $0x1b0] sm:$0xff]  ;;  %108 = vperm.xlu0 %2564, %v104_v26   ;;  %v250_v34 = vld [vmem:[#allocation11 + $0x1d8] sm:$0xff]  ;;  %v2972_v37 = vpack.c.bf16 %v243_v24, %v239_v20  ;;  %v2978_v39 = vpack.c.bf16 %v252_v33, %v248_v31  ;;  %v247_v42 = vld [vmem:[#allocation11 + $0x1c0] sm:$0xff] }
  0x83   :  { %v254_v35 = vld [vmem:[#allocation11 + $0x1f8] sm:$0xff]  ;;  %v2976_v38 = vpack.c.bf16 %v245_v30, %v241_v25  ;;  %v251_v43 = vld [vmem:[#allocation11 + $0x1e0] sm:$0xff]  ;;  %v249_v46 = vld [vmem:[#allocation11 + $0x1d0] sm:$0xff] }
  0x84   :  { %2029 = vmatpush1.bf16.msra.mxu0 %v2948_v1  ;;  %2061 = vmatpush1.bf16.msra.mxu1 %v2952_v2  ;;  %v2981_v44 = vpack.c.bf16 %v254_v35, %v250_v34  ;;  %v253_v47 = vld [vmem:[#allocation11 + $0x1f0] sm:$0xff]  ;;  %v2984_v48 = vpack.c.bf16 %v251_v43, %v247_v42  ;;  %v105_v61 = vld [vmem:[#allocation9] sm:$0xf]  ;;  %v136_v62 = vld [vmem:[#allocation12] sm:$0xf] }
  0x85   :  { %2031 = vmatprep.subr.bf16.mxu0 %v2954_v3  ;;  %2063 = vmatprep.subr.bf16.mxu1 %v2957_v8  ;;  %v2988_v49 = vpack.c.bf16 %v253_v47, %v249_v46  ;;  %v255_v50 = vld [vmem:[#allocation4] sm:$0x1]  ;;  %v115_v63 = vrot.slane %v105_v61, %v114_v56  ;;  %v119_v4 = vrot.slane %v105_v61, %v118_v57  ;;  %v2773_v35 = vmov 1966171168  }
  0x86   :  { %v123_v6 = vrot.slane %v105_v61, %v122_v59  ;;  %v127_v7 = vrot.slane %v105_v61, %v126_v60  ;;  %v141_v11 = vrot.slane %v136_v62, %v114_v56  ;;  %v145_v12 = vrot.slane %v136_v62, %v118_v57 }
  0x87   :  { %v149_v13 = vrot.slane %v136_v62, %v122_v59  ;;  %v153_v15 = vrot.slane %v136_v62, %v126_v60  ;;  %v407_v42 = vunpack.c.l.s4 %v2773_v35  ;;  %v2774_v46 = vmov 0.5  }
  0x88   :  { %2033 = vmatpush1.bf16.msra.mxu0 %v2960_v17  ;;  %2065 = vmatpush1.bf16.msra.mxu1 %v2964_v21  ;;  %v434_v47 = vcombine.low %v2774_v46, %v2774_v46 }
  0x89   :  { %2035 = vmatprep.subr.bf16.mxu0 %v2966_v22  ;;  %2067 = vmatprep.subr.bf16.mxu1 %v2969_v29  ;;  %v408_v43 = vunpack.c.0.s8 %v407_v42  ;;  %v256_v42 = vld [vmem:[#allocation5] sm:$0x1] }
  0x8b   :  { %v3029_v56 = vsub.s32 %v408_v43, %v113_v55 }
  0x8c   :  { %2037 = vmatpush1.bf16.msra.mxu0 %v2972_v37  ;;  %2069 = vmatpush1.bf16.msra.mxu1 %v2976_v38 }
  0x8d   :  { %2039 = vmatprep.subr.bf16.mxu0 %v2978_v39  ;;  %2071 = vmatprep.subr.bf16.mxu1 %v2981_v44  ;;  %v442_v61 = vrot.slane %v434_v47, %v3029_v56 }
  0x90   :  { %2041 = vmatpush1.bf16.msra.mxu0 %v2984_v48  ;;  %2073 = vmatpush1.bf16.msra.mxu1 %v2988_v49 }
  0x91   :  { %2075 = vmatprep.subr.bf16.mxu0 %v2897_v5  ;;  %2107 = vmatprep.subr.bf16.mxu1 %v2899_v9 }
  0x93   :  { %323 = vmatmul.mubr.f32.vlgmr.msra.gmra.mrb[0].mxu0 %v255_v50  ;;  %394 = vmatmul.mubr.f32.vlgmr.msra.gmra.mrb[0].mxu1 %v255_v50  ;;  %v2775_v50 = vmov 1.0  }
  0x94   :  { %2077 = vmatpush1.bf16.msra.mxu0 %v2901_v10  ;;  %2109 = vmatpush1.bf16.msra.mxu1 %v2904_v14  ;;  %v435_v51 = vcombine.low %v2774_v46, %v2775_v50 }
  0x95   :  { %2079 = vmatprep.subr.bf16.mxu0 %v2908_v18  ;;  %2111 = vmatprep.subr.bf16.mxu1 %v2910_v19 }
  0x96   :  { %571 = vmatprep.mubr.f32.mxu0 %v2771_v0  ;;  %642 = vmatprep.mubr.f32.mxu1 %v2771_v0  ;;  %v449_v62 = vrot.slane %v435_v51, %v3029_v56 }
  0x98   :  { %2081 = vmatpush1.bf16.msra.mxu0 %v2913_v23  ;;  %2113 = vmatpush1.bf16.msra.mxu1 %v2917_v27 }
  0x99   :  { %2083 = vmatprep.subr.bf16.mxu0 %v2919_v28  ;;  %2115 = vmatprep.subr.bf16.mxu1 %v2921_v32 }
  0x9c   :  { %2085 = vmatpush1.bf16.msra.mxu0 %v2924_v36  ;;  %2117 = vmatpush1.bf16.msra.mxu1 %v2928_v40 }
  0x9d   :  { %2087 = vmatprep.subr.bf16.mxu0 %v2930_v41  ;;  %2119 = vmatprep.subr.bf16.mxu1 %v2933_v45 }
  0xa0   :  { %2089 = vmatpush1.bf16.msra.mxu0 %v2936_v52  ;;  %2121 = vmatpush1.bf16.msra.mxu1 %v2940_v53 }
  0xa1   :  { %2091 = vmatprep.subr.bf16.mxu0 %v2942_v54  ;;  %2123 = vmatprep.subr.bf16.mxu1 %v2945_v58 }
  0xa4   :  { %2093 = vmatpush1.bf16.msra.mxu0 %v2948_v1  ;;  %2125 = vmatpush1.bf16.msra.mxu1 %v2952_v2 }
  0xa5   :  { %2095 = vmatprep.subr.bf16.mxu0 %v2954_v3  ;;  %2127 = vmatprep.subr.bf16.mxu1 %v2957_v8 }
  0xa8   :  { %2097 = vmatpush1.bf16.msra.mxu0 %v2960_v17  ;;  %2129 = vmatpush1.bf16.msra.mxu1 %v2964_v21 }
  0xa9   :  { %2099 = vmatprep.subr.bf16.mxu0 %v2966_v22  ;;  %2131 = vmatprep.subr.bf16.mxu1 %v2969_v29 }
  0xac   :  { %2101 = vmatpush1.bf16.msra.mxu0 %v2972_v37  ;;  %2133 = vmatpush1.bf16.msra.mxu1 %v2976_v38 }
  0xad   :  { %2103 = vmatprep.subr.bf16.mxu0 %v2978_v39  ;;  %2135 = vmatprep.subr.bf16.mxu1 %v2981_v44 }
  0xb0   :  { %2105 = vmatpush1.bf16.msra.mxu0 %v2984_v48  ;;  %2137 = vmatpush1.bf16.msra.mxu1 %v2988_v49 }
  0xb1   :  { %2139 = vmatprep.subr.bf16.mxu0 %v2897_v5  ;;  %2171 = vmatprep.subr.bf16.mxu1 %v2899_v9 }
 0x101   :  { %v109_v16 = vpop.permute.xlu0 %108 }
 0x102   :  { %v132_v20 = vmul.f32 %v115_v63, %v109_v16  ;;  %v133_v24 = vmul.f32 %v119_v4, %v109_v16  ;;  %v134_v25 = vmul.f32 %v123_v6, %v109_v16  ;;  %v135_v26 = vmul.f32 %v127_v7, %v109_v16 }
 0x104   :  { %v158_v30 = vadd.f32 %v141_v11, %v132_v20  ;;  %v159_v31 = vadd.f32 %v145_v12, %v133_v24  ;;  %v160_v33 = vadd.f32 %v149_v13, %v134_v25  ;;  %v161_v34 = vadd.f32 %v153_v15, %v135_v26 }
 0x105   :  { %v450_v12 = vcombine.low %v442_v61, %v449_v62  ;;  %v467_v24 = vcombine.low %v2774_v46, %v2771_v0 }
 0x106   :  { %162 = vst [vmem:[#allocation2] sm:$0xff] %v158_v30  ;;  %163 = vst [vmem:[#allocation2 + $0x8] sm:$0xff] %v159_v31 }
 0x107   :  { %164 = vst [vmem:[#allocation2 + $0x10] sm:$0xff] %v160_v33  ;;  %165 = vst [vmem:[#allocation2 + $0x18] sm:$0xff] %v161_v34  ;;  %v3037_v16 = vrot.slane %v450_v12, %v3029_v56  ;;  %v481_v26 = vrot.slane %v467_v24, %v3029_v56 }
 0x109   :  { %v482_v30 = vcombine.low %v442_v61, %v481_v26 }
 0x10b   :  { %v3043_v31 = vrot.slane %v482_v30, %v3029_v56 }
 0x10e   :  { %v257_v15 = vld [vmem:[#allocation2] ss:$8 sm:$0xf] }
 0x166   :  { %v324_v57 = vpop.f32.mrb[0].mxu0  ;;  %v395_v59 = vpop.f32.mrb[0].mxu1 }
 0x167   :  { %v326_v60 = vpop.f32.mrb[1].mxu0  ;;  %v397_v4 = vpop.f32.mrb[1].mxu1 }
 0x168   :  { %v404_v63 = vcombine.low %v324_v57, %v326_v60  ;;  %v405_v6 = vcombine.low %v395_v59, %v397_v4 }
 0x16a   :  { %v412_v7 = vrot.slane %v404_v63, %v3029_v56  ;;  %v419_v11 = vrot.slane %v405_v6, %v3029_v56 }
 0x16c   :  { %v420_v13 = vcombine.low %v412_v7, %v419_v11 }
 0x16e   :  { %v427_v55 = vrot.slane %v420_v13, %v3029_v56 }
 0x170   :  { %v429_v20 = vadd.f32 %v427_v55, %v257_v15  ;;  %v506_v55 = vld [vmem:[#allocation2 + $0x1] ss:$8 sm:$0xf] }
 0x172   :  { %v459_v25 = vmul.f32 %v3037_v16, %v429_v20 }
 0x174   :  { %2565 = vtanh.f32 %v459_v25 }
 0x17e   :  { %v2566_v33 = vpop.eup %2565 }
 0x17f   :  { %v461_v34 = vmul.f32 %v2566_v33, %v3037_v16 }
 0x181   :  { %v491_v35 = vadd.f32 %v3043_v31, %v461_v34 }
 0x183   :  { %v493_v43 = vrot.slane %v491_v35, 1  ;;  %v496_v47 = vrot.slane %v491_v35, 3  ;;  %v501_v57 = vrot.slane %v491_v35, 2 }
 0x185   :  { %v495_v50 = vmul.f32 %v493_v43, %v256_v42  ;;  %v498_v51 = vmul.f32 %v496_v47, %v491_v35 }
 0x187   :  { %v499_v46 = vadd.f32 %v498_v51, %v495_v50 }
 0x189   :  { %2567 = vtanh.f32 %v499_v46 }
 0x193   :  { %v2568_v59 = vpop.eup %2567 }
 0x194   :  { %v503_v60 = vmul.f32 %v2568_v59, %v501_v57 }
 0x196   :  { %504 = vst [vmem:[#allocation3] sm:$0x1] %v503_v60  ;;  %572 = vmatmul.mubr.f32.vlgmr.msra.gmra.mrb[2].mxu0 %v503_v60  ;;  %643 = vmatmul.mubr.f32.vlgmr.msra.gmra.mrb[2].mxu1 %v503_v60 }
 0x197   :  { %2141 = vmatpush1.bf16.msra.mxu0 %v2901_v10  ;;  %2173 = vmatpush1.bf16.msra.mxu1 %v2904_v14 }
 0x198   :  { %2143 = vmatprep.subr.bf16.mxu0 %v2908_v18  ;;  %2175 = vmatprep.subr.bf16.mxu1 %v2910_v19 }
 0x199   :  { %762 = vmatprep.mubr.f32.mxu0 %v2771_v0  ;;  %833 = vmatprep.mubr.f32.mxu1 %v2771_v0 }
 0x19b   :  { %2145 = vmatpush1.bf16.msra.mxu0 %v2913_v23  ;;  %2177 = vmatpush1.bf16.msra.mxu1 %v2917_v27 }
 0x19c   :  { %2147 = vmatprep.subr.bf16.mxu0 %v2919_v28  ;;  %2179 = vmatprep.subr.bf16.mxu1 %v2921_v32 }
 0x19f   :  { %2149 = vmatpush1.bf16.msra.mxu0 %v2924_v36  ;;  %2181 = vmatpush1.bf16.msra.mxu1 %v2928_v40 }
 0x1a0   :  { %2151 = vmatprep.subr.bf16.mxu0 %v2930_v41  ;;  %2183 = vmatprep.subr.bf16.mxu1 %v2933_v45 }
 0x1a3   :  { %2153 = vmatpush1.bf16.msra.mxu0 %v2936_v52  ;;  %2185 = vmatpush1.bf16.msra.mxu1 %v2940_v53 }
 0x1a4   :  { %2155 = vmatprep.subr.bf16.mxu0 %v2942_v54  ;;  %2187 = vmatprep.subr.bf16.mxu1 %v2945_v58 }
 0x1a7   :  { %2157 = vmatpush1.bf16.msra.mxu0 %v2948_v1  ;;  %2189 = vmatpush1.bf16.msra.mxu1 %v2952_v2 }
 0x1a8   :  { %2159 = vmatprep.subr.bf16.mxu0 %v2954_v3  ;;  %2191 = vmatprep.subr.bf16.mxu1 %v2957_v8 }
 0x1ab   :  { %2161 = vmatpush1.bf16.msra.mxu0 %v2960_v17  ;;  %2193 = vmatpush1.bf16.msra.mxu1 %v2964_v21 }
 0x1ac   :  { %2163 = vmatprep.subr.bf16.mxu0 %v2966_v22  ;;  %2195 = vmatprep.subr.bf16.mxu1 %v2969_v29 }
 0x1af   :  { %2165 = vmatpush1.bf16.msra.mxu0 %v2972_v37  ;;  %2197 = vmatpush1.bf16.msra.mxu1 %v2976_v38 }
 0x1b0   :  { %2167 = vmatprep.subr.bf16.mxu0 %v2978_v39  ;;  %2199 = vmatprep.subr.bf16.mxu1 %v2981_v44 }
 0x1b3   :  { %2169 = vmatpush1.bf16.msra.mxu0 %v2984_v48  ;;  %2201 = vmatpush1.bf16.msra.mxu1 %v2988_v49 }
 0x1b4   :  { %2203 = vmatprep.subr.bf16.mxu0 %v2897_v5  ;;  %2235 = vmatprep.subr.bf16.mxu1 %v2899_v9 }
 0x269   :  { %v573_v61 = vpop.f32.mrb[2].mxu0  ;;  %v644_v62 = vpop.f32.mrb[2].mxu1 }
 0x26a   :  { %v575_v63 = vpop.f32.mrb[3].mxu0  ;;  %v646_v4 = vpop.f32.mrb[3].mxu1 }
 0x26b   :  { %v653_v6 = vcombine.low %v573_v61, %v575_v63  ;;  %v654_v7 = vcombine.low %v644_v62, %v646_v4 }
 0x26d   :  { %v661_v11 = vrot.slane %v653_v6, %v3029_v56  ;;  %v668_v12 = vrot.slane %v654_v7, %v3029_v56 }
 0x26f   :  { %v669_v13 = vcombine.low %v661_v11, %v668_v12  ;;  %v697_v11 = vld [vmem:[#allocation2 + $0x2] ss:$8 sm:$0xf] }
 0x271   :  { %v676_v15 = vrot.slane %v669_v13, %v3029_v56 }
 0x273   :  { %v678_v20 = vadd.f32 %v676_v15, %v506_v55 }
 0x275   :  { %v679_v24 = vmul.f32 %v678_v20, %v3037_v16 }
 0x277   :  { %2569 = vtanh.f32 %v679_v24 }
 0x281   :  { %v2570_v25 = vpop.eup %2569 }
 0x282   :  { %v681_v26 = vmul.f32 %v2570_v25, %v3037_v16 }
 0x284   :  { %v682_v30 = vadd.f32 %v681_v26, %v3043_v31 }
 0x286   :  { %v684_v33 = vrot.slane %v682_v30, 1  ;;  %v687_v34 = vrot.slane %v682_v30, 3  ;;  %v692_v47 = vrot.slane %v682_v30, 2 }
 0x288   :  { %v686_v35 = vmul.f32 %v684_v33, %v499_v46  ;;  %v689_v42 = vmul.f32 %v687_v34, %v682_v30 }
 0x28a   :  { %v690_v43 = vadd.f32 %v689_v42, %v686_v35 }
 0x28c   :  { %2571 = vtanh.f32 %v690_v43 }
 0x296   :  { %v2572_v50 = vpop.eup %2571 }
 0x297   :  { %v694_v51 = vmul.f32 %v2572_v50, %v692_v47 }
 0x299   :  { %695 = vst [vmem:[#allocation3 + $0x1] sm:$0x1] %v694_v51  ;;  %763 = vmatmul.mubr.f32.vlgmr.msra.gmra.mrb[4].mxu0 %v694_v51  ;;  %834 = vmatmul.mubr.f32.vlgmr.msra.gmra.mrb[4].mxu1 %v694_v51 }
 0x29a   :  { %2205 = vmatpush1.bf16.msra.mxu0 %v2901_v10  ;;  %2237 = vmatpush1.bf16.msra.mxu1 %v2904_v14 }
 0x29b   :  { %2207 = vmatprep.subr.bf16.mxu0 %v2908_v18  ;;  %2239 = vmatprep.subr.bf16.mxu1 %v2910_v19 }
 0x29c   :  { %953 = vmatprep.mubr.f32.mxu0 %v2771_v0  ;;  %1024 = vmatprep.mubr.f32.mxu1 %v2771_v0 }
 0x29e   :  { %2209 = vmatpush1.bf16.msra.mxu0 %v2913_v23  ;;  %2241 = vmatpush1.bf16.msra.mxu1 %v2917_v27 }
 0x29f   :  { %2211 = vmatprep.subr.bf16.mxu0 %v2919_v28  ;;  %2243 = vmatprep.subr.bf16.mxu1 %v2921_v32 }
 0x2a2   :  { %2213 = vmatpush1.bf16.msra.mxu0 %v2924_v36  ;;  %2245 = vmatpush1.bf16.msra.mxu1 %v2928_v40 }
 0x2a3   :  { %2215 = vmatprep.subr.bf16.mxu0 %v2930_v41  ;;  %2247 = vmatprep.subr.bf16.mxu1 %v2933_v45 }
 0x2a6   :  { %2217 = vmatpush1.bf16.msra.mxu0 %v2936_v52  ;;  %2249 = vmatpush1.bf16.msra.mxu1 %v2940_v53 }
 0x2a7   :  { %2219 = vmatprep.subr.bf16.mxu0 %v2942_v54  ;;  %2251 = vmatprep.subr.bf16.mxu1 %v2945_v58 }
 0x2aa   :  { %2221 = vmatpush1.bf16.msra.mxu0 %v2948_v1  ;;  %2253 = vmatpush1.bf16.msra.mxu1 %v2952_v2 }
 0x2ab   :  { %2223 = vmatprep.subr.bf16.mxu0 %v2954_v3  ;;  %2255 = vmatprep.subr.bf16.mxu1 %v2957_v8 }
 0x2ae   :  { %2225 = vmatpush1.bf16.msra.mxu0 %v2960_v17  ;;  %2257 = vmatpush1.bf16.msra.mxu1 %v2964_v21 }
 0x2af   :  { %2227 = vmatprep.subr.bf16.mxu0 %v2966_v22  ;;  %2259 = vmatprep.subr.bf16.mxu1 %v2969_v29 }
 0x2b2   :  { %2229 = vmatpush1.bf16.msra.mxu0 %v2972_v37  ;;  %2261 = vmatpush1.bf16.msra.mxu1 %v2976_v38 }
 0x2b3   :  { %2231 = vmatprep.subr.bf16.mxu0 %v2978_v39  ;;  %2263 = vmatprep.subr.bf16.mxu1 %v2981_v44 }
 0x2b6   :  { %2233 = vmatpush1.bf16.msra.mxu0 %v2984_v48  ;;  %2265 = vmatpush1.bf16.msra.mxu1 %v2988_v49 }
 0x2b7   :  { %2267 = vmatprep.subr.bf16.mxu0 %v2897_v5  ;;  %2299 = vmatprep.subr.bf16.mxu1 %v2899_v9 }
 0x36c   :  { %v764_v46 = vpop.f32.mrb[4].mxu0  ;;  %v835_v57 = vpop.f32.mrb[4].mxu1 }
 0x36d   :  { %v766_v59 = vpop.f32.mrb[5].mxu0  ;;  %v837_v60 = vpop.f32.mrb[5].mxu1 }
 0x36e   :  { %v844_v61 = vcombine.low %v764_v46, %v766_v59  ;;  %v845_v62 = vcombine.low %v835_v57, %v837_v60 }
 0x370   :  { %v852_v63 = vrot.slane %v844_v61, %v3029_v56  ;;  %v859_v4 = vrot.slane %v845_v62, %v3029_v56 }
 0x372   :  { %v860_v6 = vcombine.low %v852_v63, %v859_v4  ;;  %v888_v63 = vld [vmem:[#allocation2 + $0x3] ss:$8 sm:$0xf] }
 0x374   :  { %v867_v7 = vrot.slane %v860_v6, %v3029_v56 }
 0x376   :  { %v869_v12 = vadd.f32 %v867_v7, %v697_v11 }
 0x378   :  { %v870_v13 = vmul.f32 %v869_v12, %v3037_v16 }
 0x37a   :  { %2573 = vtanh.f32 %v870_v13 }
 0x384   :  { %v2574_v15 = vpop.eup %2573 }
 0x385   :  { %v872_v55 = vmul.f32 %v2574_v15, %v3037_v16 }
 0x387   :  { %v873_v20 = vadd.f32 %v872_v55, %v3043_v31 }
 0x389   :  { %v875_v24 = vrot.slane %v873_v20, 1  ;;  %v878_v25 = vrot.slane %v873_v20, 3  ;;  %v883_v34 = vrot.slane %v873_v20, 2 }
 0x38b   :  { %v877_v26 = vmul.f32 %v875_v24, %v690_v43  ;;  %v880_v30 = vmul.f32 %v878_v25, %v873_v20 }
 0x38d   :  { %v881_v33 = vadd.f32 %v880_v30, %v877_v26 }
 0x38f   :  { %2575 = vtanh.f32 %v881_v33 }
 0x399   :  { %v2576_v35 = vpop.eup %2575 }
 0x39a   :  { %v885_v42 = vmul.f32 %v2576_v35, %v883_v34 }
 0x39c   :  { %886 = vst [vmem:[#allocation3 + $0x2] sm:$0x1] %v885_v42  ;;  %954 = vmatmul.mubr.f32.vlgmr.msra.gmra.mrb[6].mxu0 %v885_v42  ;;  %1025 = vmatmul.mubr.f32.vlgmr.msra.gmra.mrb[6].mxu1 %v885_v42 }
 0x39d   :  { %2269 = vmatpush1.bf16.msra.mxu0 %v2901_v10  ;;  %2301 = vmatpush1.bf16.msra.mxu1 %v2904_v14 }
 0x39e   :  { %2271 = vmatprep.subr.bf16.mxu0 %v2908_v18  ;;  %2303 = vmatprep.subr.bf16.mxu1 %v2910_v19 }
 0x39f   :  { %1144 = vmatprep.mubr.f32.mxu0 %v2771_v0  ;;  %1215 = vmatprep.mubr.f32.mxu1 %v2771_v0 }
 0x3a1   :  { %2273 = vmatpush1.bf16.msra.mxu0 %v2913_v23  ;;  %2305 = vmatpush1.bf16.msra.mxu1 %v2917_v27 }
 0x3a2   :  { %2275 = vmatprep.subr.bf16.mxu0 %v2919_v28  ;;  %2307 = vmatprep.subr.bf16.mxu1 %v2921_v32 }
 0x3a5   :  { %2277 = vmatpush1.bf16.msra.mxu0 %v2924_v36  ;;  %2309 = vmatpush1.bf16.msra.mxu1 %v2928_v40 }
 0x3a6   :  { %2279 = vmatprep.subr.bf16.mxu0 %v2930_v41  ;;  %2311 = vmatprep.subr.bf16.mxu1 %v2933_v45 }
 0x3a9   :  { %2281 = vmatpush1.bf16.msra.mxu0 %v2936_v52  ;;  %2313 = vmatpush1.bf16.msra.mxu1 %v2940_v53 }
 0x3aa   :  { %2283 = vmatprep.subr.bf16.mxu0 %v2942_v54  ;;  %2315 = vmatprep.subr.bf16.mxu1 %v2945_v58 }
 0x3ad   :  { %2285 = vmatpush1.bf16.msra.mxu0 %v2948_v1  ;;  %2317 = vmatpush1.bf16.msra.mxu1 %v2952_v2 }
 0x3ae   :  { %2287 = vmatprep.subr.bf16.mxu0 %v2954_v3  ;;  %2319 = vmatprep.subr.bf16.mxu1 %v2957_v8 }
 0x3b1   :  { %2289 = vmatpush1.bf16.msra.mxu0 %v2960_v17  ;;  %2321 = vmatpush1.bf16.msra.mxu1 %v2964_v21 }
 0x3b2   :  { %2291 = vmatprep.subr.bf16.mxu0 %v2966_v22  ;;  %2323 = vmatprep.subr.bf16.mxu1 %v2969_v29 }
 0x3b5   :  { %2293 = vmatpush1.bf16.msra.mxu0 %v2972_v37  ;;  %2325 = vmatpush1.bf16.msra.mxu1 %v2976_v38 }
 0x3b6   :  { %2295 = vmatprep.subr.bf16.mxu0 %v2978_v39  ;;  %2327 = vmatprep.subr.bf16.mxu1 %v2981_v44 }
 0x3b9   :  { %2297 = vmatpush1.bf16.msra.mxu0 %v2984_v48  ;;  %2329 = vmatpush1.bf16.msra.mxu1 %v2988_v49 }
 0x3ba   :  { %2331 = vmatprep.subr.bf16.mxu0 %v2897_v5  ;;  %2363 = vmatprep.subr.bf16.mxu1 %v2899_v9 }
 0x46f   :  { %v955_v43 = vpop.f32.mrb[6].mxu0  ;;  %v1026_v47 = vpop.f32.mrb[6].mxu1 }
 0x470   :  { %v957_v50 = vpop.f32.mrb[7].mxu0  ;;  %v1028_v51 = vpop.f32.mrb[7].mxu1 }
 0x471   :  { %v1035_v46 = vcombine.low %v955_v43, %v957_v50  ;;  %v1036_v57 = vcombine.low %v1026_v47, %v1028_v51 }
 0x473   :  { %v1043_v59 = vrot.slane %v1035_v46, %v3029_v56  ;;  %v1050_v60 = vrot.slane %v1036_v57, %v3029_v56 }
 0x475   :  { %v1051_v61 = vcombine.low %v1043_v59, %v1050_v60  ;;  %v1079_v59 = vld [vmem:[#allocation2 + $0x4] ss:$8 sm:$0xf] }
 0x477   :  { %v1058_v62 = vrot.slane %v1051_v61, %v3029_v56 }
 0x479   :  { %v1060_v4 = vadd.f32 %v1058_v62, %v888_v63 }
 0x47b   :  { %v1061_v6 = vmul.f32 %v1060_v4, %v3037_v16 }
 0x47d   :  { %2577 = vtanh.f32 %v1061_v6 }
 0x487   :  { %v2578_v7 = vpop.eup %2577 }
 0x488   :  { %v1063_v11 = vmul.f32 %v2578_v7, %v3037_v16 }
 0x48a   :  { %v1064_v12 = vadd.f32 %v1063_v11, %v3043_v31 }
 0x48c   :  { %v1066_v13 = vrot.slane %v1064_v12, 1  ;;  %v1069_v15 = vrot.slane %v1064_v12, 3  ;;  %v1074_v25 = vrot.slane %v1064_v12, 2 }
 0x48e   :  { %v1068_v55 = vmul.f32 %v1066_v13, %v881_v33  ;;  %v1071_v20 = vmul.f32 %v1069_v15, %v1064_v12 }
 0x490   :  { %v1072_v24 = vadd.f32 %v1071_v20, %v1068_v55 }
 0x492   :  { %2579 = vtanh.f32 %v1072_v24 }
 0x49c   :  { %v2580_v26 = vpop.eup %2579 }
 0x49d   :  { %v1076_v30 = vmul.f32 %v2580_v26, %v1074_v25 }
 0x49f   :  { %1077 = vst [vmem:[#allocation3 + $0x3] sm:$0x1] %v1076_v30  ;;  %1145 = vmatmul.mubr.f32.vlgmr.msra.gmra.mrb[8].mxu0 %v1076_v30  ;;  %1216 = vmatmul.mubr.f32.vlgmr.msra.gmra.mrb[8].mxu1 %v1076_v30 }
 0x4a0   :  { %2333 = vmatpush1.bf16.msra.mxu0 %v2901_v10  ;;  %2365 = vmatpush1.bf16.msra.mxu1 %v2904_v14 }
 0x4a1   :  { %2335 = vmatprep.subr.bf16.mxu0 %v2908_v18  ;;  %2367 = vmatprep.subr.bf16.mxu1 %v2910_v19 }
 0x4a2   :  { %1335 = vmatprep.mubr.f32.mxu0 %v2771_v0  ;;  %1406 = vmatprep.mubr.f32.mxu1 %v2771_v0 }
 0x4a4   :  { %2337 = vmatpush1.bf16.msra.mxu0 %v2913_v23  ;;  %2369 = vmatpush1.bf16.msra.mxu1 %v2917_v27 }
 0x4a5   :  { %2339 = vmatprep.subr.bf16.mxu0 %v2919_v28  ;;  %2371 = vmatprep.subr.bf16.mxu1 %v2921_v32 }
 0x4a8   :  { %2341 = vmatpush1.bf16.msra.mxu0 %v2924_v36  ;;  %2373 = vmatpush1.bf16.msra.mxu1 %v2928_v40 }
 0x4a9   :  { %2343 = vmatprep.subr.bf16.mxu0 %v2930_v41  ;;  %2375 = vmatprep.subr.bf16.mxu1 %v2933_v45 }
 0x4ac   :  { %2345 = vmatpush1.bf16.msra.mxu0 %v2936_v52  ;;  %2377 = vmatpush1.bf16.msra.mxu1 %v2940_v53 }
 0x4ad   :  { %2347 = vmatprep.subr.bf16.mxu0 %v2942_v54  ;;  %2379 = vmatprep.subr.bf16.mxu1 %v2945_v58 }
 0x4b0   :  { %2349 = vmatpush1.bf16.msra.mxu0 %v2948_v1  ;;  %2381 = vmatpush1.bf16.msra.mxu1 %v2952_v2 }
 0x4b1   :  { %2351 = vmatprep.subr.bf16.mxu0 %v2954_v3  ;;  %2383 = vmatprep.subr.bf16.mxu1 %v2957_v8 }
 0x4b4   :  { %2353 = vmatpush1.bf16.msra.mxu0 %v2960_v17  ;;  %2385 = vmatpush1.bf16.msra.mxu1 %v2964_v21 }
 0x4b5   :  { %2355 = vmatprep.subr.bf16.mxu0 %v2966_v22  ;;  %2387 = vmatprep.subr.bf16.mxu1 %v2969_v29 }
 0x4b8   :  { %2357 = vmatpush1.bf16.msra.mxu0 %v2972_v37  ;;  %2389 = vmatpush1.bf16.msra.mxu1 %v2976_v38 }
 0x4b9   :  { %2359 = vmatprep.subr.bf16.mxu0 %v2978_v39  ;;  %2391 = vmatprep.subr.bf16.mxu1 %v2981_v44 }
 0x4bc   :  { %2361 = vmatpush1.bf16.msra.mxu0 %v2984_v48  ;;  %2393 = vmatpush1.bf16.msra.mxu1 %v2988_v49 }
 0x4bd   :  { %2395 = vmatprep.subr.bf16.mxu0 %v2897_v5  ;;  %2427 = vmatprep.subr.bf16.mxu1 %v2899_v9 }
 0x572   :  { %v1146_v33 = vpop.f32.mrb[8].mxu0  ;;  %v1217_v34 = vpop.f32.mrb[8].mxu1 }
 0x573   :  { %v1148_v35 = vpop.f32.mrb[9].mxu0  ;;  %v1219_v42 = vpop.f32.mrb[9].mxu1 }
 0x574   :  { %v1226_v43 = vcombine.low %v1146_v33, %v1148_v35  ;;  %v1227_v47 = vcombine.low %v1217_v34, %v1219_v42 }
 0x576   :  { %v1234_v50 = vrot.slane %v1226_v43, %v3029_v56  ;;  %v1241_v51 = vrot.slane %v1227_v47, %v3029_v56 }
 0x578   :  { %v1242_v46 = vcombine.low %v1234_v50, %v1241_v51  ;;  %v1270_v50 = vld [vmem:[#allocation2 + $0x5] ss:$8 sm:$0xf] }
 0x57a   :  { %v1249_v57 = vrot.slane %v1242_v46, %v3029_v56 }
 0x57c   :  { %v1251_v60 = vadd.f32 %v1249_v57, %v1079_v59 }
 0x57e   :  { %v1252_v61 = vmul.f32 %v1251_v60, %v3037_v16 }
 0x580   :  { %2581 = vtanh.f32 %v1252_v61 }
 0x58a   :  { %v2582_v62 = vpop.eup %2581 }
 0x58b   :  { %v1254_v63 = vmul.f32 %v2582_v62, %v3037_v16 }
 0x58d   :  { %v1255_v4 = vadd.f32 %v1254_v63, %v3043_v31 }
 0x58f   :  { %v1257_v6 = vrot.slane %v1255_v4, 1  ;;  %v1260_v7 = vrot.slane %v1255_v4, 3  ;;  %v1265_v15 = vrot.slane %v1255_v4, 2 }
 0x591   :  { %v1259_v11 = vmul.f32 %v1257_v6, %v1072_v24  ;;  %v1262_v12 = vmul.f32 %v1260_v7, %v1255_v4 }
 0x593   :  { %v1263_v13 = vadd.f32 %v1262_v12, %v1259_v11  ;;  %v1849_v12 = vld [vmem:[#allocation14 + $0x20] sm:$0xff] }
 0x595   :  { %2583 = vtanh.f32 %v1263_v13 }
 0x59f   :  { %v2584_v55 = vpop.eup %2583 }
 0x5a0   :  { %v1267_v20 = vmul.f32 %v2584_v55, %v1265_v15  ;;  %v1851_v55 = vld [vmem:[#allocation14 + $0x30] sm:$0xff] }
 0x5a2   :  { %1268 = vst [vmem:[#allocation3 + $0x4] sm:$0x1] %v1267_v20  ;;  %1336 = vmatmul.mubr.f32.vlgmr.msra.gmra.mrb[10].mxu0 %v1267_v20  ;;  %1407 = vmatmul.mubr.f32.vlgmr.msra.gmra.mrb[10].mxu1 %v1267_v20  ;;  %v1852_v20 = vld [vmem:[#allocation14 + $0x38] sm:$0xff] }
 0x5a3   :  { %2397 = vmatpush1.bf16.msra.mxu0 %v2901_v10  ;;  %2429 = vmatpush1.bf16.msra.mxu1 %v2904_v14 }
 0x5a4   :  { %2399 = vmatprep.subr.bf16.mxu0 %v2908_v18  ;;  %2431 = vmatprep.subr.bf16.mxu1 %v2910_v19 }
 0x5a5   :  { %1526 = vmatprep.mubr.f32.mxu0 %v2771_v0  ;;  %1597 = vmatprep.mubr.f32.mxu1 %v2771_v0 }
 0x5a7   :  { %2401 = vmatpush1.bf16.msra.mxu0 %v2913_v23  ;;  %2433 = vmatpush1.bf16.msra.mxu1 %v2917_v27 }
 0x5a8   :  { %2403 = vmatprep.subr.bf16.mxu0 %v2919_v28  ;;  %2435 = vmatprep.subr.bf16.mxu1 %v2921_v32 }
 0x5ab   :  { %2405 = vmatpush1.bf16.msra.mxu0 %v2924_v36  ;;  %2437 = vmatpush1.bf16.msra.mxu1 %v2928_v40 }
 0x5ac   :  { %2407 = vmatprep.subr.bf16.mxu0 %v2930_v41  ;;  %2439 = vmatprep.subr.bf16.mxu1 %v2933_v45 }
 0x5af   :  { %2409 = vmatpush1.bf16.msra.mxu0 %v2936_v52  ;;  %2441 = vmatpush1.bf16.msra.mxu1 %v2940_v53 }
 0x5b0   :  { %2411 = vmatprep.subr.bf16.mxu0 %v2942_v54  ;;  %2443 = vmatprep.subr.bf16.mxu1 %v2945_v58 }
 0x5b3   :  { %2413 = vmatpush1.bf16.msra.mxu0 %v2948_v1  ;;  %2445 = vmatpush1.bf16.msra.mxu1 %v2952_v2 }
 0x5b4   :  { %2415 = vmatprep.subr.bf16.mxu0 %v2954_v3  ;;  %2447 = vmatprep.subr.bf16.mxu1 %v2957_v8 }
 0x5b7   :  { %2417 = vmatpush1.bf16.msra.mxu0 %v2960_v17  ;;  %2449 = vmatpush1.bf16.msra.mxu1 %v2964_v21 }
 0x5b8   :  { %2419 = vmatprep.subr.bf16.mxu0 %v2966_v22  ;;  %2451 = vmatprep.subr.bf16.mxu1 %v2969_v29 }
 0x5bb   :  { %2421 = vmatpush1.bf16.msra.mxu0 %v2972_v37  ;;  %2453 = vmatpush1.bf16.msra.mxu1 %v2976_v38 }
 0x5bc   :  { %2423 = vmatprep.subr.bf16.mxu0 %v2978_v39  ;;  %2455 = vmatprep.subr.bf16.mxu1 %v2981_v44 }
 0x5bf   :  { %2425 = vmatpush1.bf16.msra.mxu0 %v2984_v48  ;;  %2457 = vmatpush1.bf16.msra.mxu1 %v2988_v49 }
 0x5c0   :  { %2459 = vmatprep.subr.bf16.mxu0 %v2897_v5  ;;  %2491 = vmatprep.subr.bf16.mxu1 %v2899_v9 }
 0x675   :  { %v1337_v24 = vpop.f32.mrb[10].mxu0  ;;  %v1408_v25 = vpop.f32.mrb[10].mxu1 }
 0x676   :  { %v1339_v26 = vpop.f32.mrb[11].mxu0  ;;  %v1410_v30 = vpop.f32.mrb[11].mxu1 }
 0x677   :  { %v1417_v33 = vcombine.low %v1337_v24, %v1339_v26  ;;  %v1418_v34 = vcombine.low %v1408_v25, %v1410_v30  ;;  %v2532_v24 = vpack.c.bf16 %v1852_v20, %v1851_v55  ;;  %v1853_v25 = vld [vmem:[#allocation14 + $0x40] sm:$0xff]  ;;  %v1854_v26 = vld [vmem:[#allocation14 + $0x48] sm:$0xff] }
 0x678   :  { %v2535_v30 = vpack.c.bf16 %v1854_v26, %v1853_v25 }
 0x679   :  { %v1425_v35 = vrot.slane %v1417_v33, %v3029_v56  ;;  %v1432_v42 = vrot.slane %v1418_v34, %v3029_v56  ;;  %v1855_v33 = vld [vmem:[#allocation14 + $0x50] sm:$0xff]  ;;  %v1856_v34 = vld [vmem:[#allocation14 + $0x58] sm:$0xff] }
 0x67b   :  { %v1433_v43 = vcombine.low %v1425_v35, %v1432_v42  ;;  %v2538_v35 = vpack.c.bf16 %v1856_v34, %v1855_v33  ;;  %v1857_v42 = vld [vmem:[#allocation14 + $0x60] sm:$0xff] }
 0x67d   :  { %v1440_v47 = vrot.slane %v1433_v43, %v3029_v56  ;;  %v1858_v43 = vld [vmem:[#allocation14 + $0x68] sm:$0xff] }
 0x67f   :  { %v1442_v51 = vadd.f32 %v1440_v47, %v1270_v50  ;;  %v2541_v47 = vpack.c.bf16 %v1858_v43, %v1857_v42  ;;  %v1859_v50 = vld [vmem:[#allocation14 + $0x70] sm:$0xff] }
 0x681   :  { %v1443_v46 = vmul.f32 %v1442_v51, %v3037_v16  ;;  %v1860_v51 = vld [vmem:[#allocation14 + $0x78] sm:$0xff] }
 0x683   :  { %2585 = vtanh.f32 %v1443_v46  ;;  %v2544_v46 = vpack.c.bf16 %v1860_v51, %v1859_v50 }
 0x68d   :  { %v2586_v5 = vpop.eup %2585 }
 0x68e   :  { %v1445_v9 = vmul.f32 %v2586_v5, %v3037_v16 }
 0x690   :  { %v1446_v57 = vadd.f32 %v1445_v9, %v3043_v31 }
 0x692   :  { %v1448_v59 = vrot.slane %v1446_v57, 1  ;;  %v1451_v60 = vrot.slane %v1446_v57, 3  ;;  %v1456_v4 = vrot.slane %v1446_v57, 2 }
 0x694   :  { %v1450_v61 = vmul.f32 %v1448_v59, %v1263_v13  ;;  %v1453_v62 = vmul.f32 %v1451_v60, %v1446_v57  ;;  %v1850_v13 = vld [vmem:[#allocation14 + $0x28] sm:$0xff] }
 0x695   :  { %v2529_v15 = vpack.c.bf16 %v1850_v13, %v1849_v12 }
 0x696   :  { %v1454_v63 = vadd.f32 %v1453_v62, %v1450_v61 }
 0x698   :  { %2587 = vtanh.f32 %v1454_v63 }
 0x6a2   :  { %v2588_v6 = vpop.eup %2587 }
 0x6a3   :  { %v1458_v7 = vmul.f32 %v2588_v6, %v1456_v4 }
 0x6a5   :  { %1459 = vst [vmem:[#allocation3 + $0x5] sm:$0x1] %v1458_v7  ;;  %1527 = vmatmul.mubr.f32.vlgmr.msra.gmra.mrb[12].mxu0 %v1458_v7  ;;  %1598 = vmatmul.mubr.f32.vlgmr.msra.gmra.mrb[12].mxu1 %v1458_v7  ;;  %v1652_v7 = vld [vmem:[#allocation2 + $0x7] ss:$8 sm:$0xf] }
 0x6a6   :  { %2461 = vmatpush1.bf16.msra.mxu0 %v2901_v10  ;;  %2493 = vmatpush1.bf16.msra.mxu1 %v2904_v14 }
 0x6a7   :  { %2463 = vmatprep.subr.bf16.mxu0 %v2908_v18  ;;  %2495 = vmatprep.subr.bf16.mxu1 %v2910_v19 }
 0x6a8   :  { %1717 = vmatprep.mubr.f32.mxu0 %v2771_v0  ;;  %1788 = vmatprep.mubr.f32.mxu1 %v2771_v0 }
 0x6aa   :  { %2465 = vmatpush1.bf16.msra.mxu0 %v2913_v23  ;;  %2497 = vmatpush1.bf16.msra.mxu1 %v2917_v27 }
 0x6ab   :  { %2467 = vmatprep.subr.bf16.mxu0 %v2919_v28  ;;  %2499 = vmatprep.subr.bf16.mxu1 %v2921_v32 }
 0x6ae   :  { %2469 = vmatpush1.bf16.msra.mxu0 %v2924_v36  ;;  %2501 = vmatpush1.bf16.msra.mxu1 %v2928_v40 }
 0x6af   :  { %2471 = vmatprep.subr.bf16.mxu0 %v2930_v41  ;;  %2503 = vmatprep.subr.bf16.mxu1 %v2933_v45  ;;  %v1461_v41 = vld [vmem:[#allocation2 + $0x6] ss:$8 sm:$0xf] }
 0x6b2   :  { %2473 = vmatpush1.bf16.msra.mxu0 %v2936_v52  ;;  %2505 = vmatpush1.bf16.msra.mxu1 %v2940_v53 }
 0x6b3   :  { %2475 = vmatprep.subr.bf16.mxu0 %v2942_v54  ;;  %2507 = vmatprep.subr.bf16.mxu1 %v2945_v58 }
 0x6b6   :  { %2477 = vmatpush1.bf16.msra.mxu0 %v2948_v1  ;;  %2509 = vmatpush1.bf16.msra.mxu1 %v2952_v2 }
 0x6b7   :  { %2479 = vmatprep.subr.bf16.mxu0 %v2954_v3  ;;  %2511 = vmatprep.subr.bf16.mxu1 %v2957_v8 }
 0x6ba   :  { %2481 = vmatpush1.bf16.msra.mxu0 %v2960_v17  ;;  %2513 = vmatpush1.bf16.msra.mxu1 %v2964_v21 }
 0x6bb   :  { %2483 = vmatprep.subr.bf16.mxu0 %v2966_v22  ;;  %2515 = vmatprep.subr.bf16.mxu1 %v2969_v29 }
 0x6be   :  { %2485 = vmatpush1.bf16.msra.mxu0 %v2972_v37  ;;  %2517 = vmatpush1.bf16.msra.mxu1 %v2976_v38  ;;  %v1845_v37 = vld [vmem:[#allocation14] sm:$0xff]  ;;  %v1846_v38 = vld [vmem:[#allocation14 + $0x8] sm:$0xff] }
 0x6bf   :  { %2487 = vmatprep.subr.bf16.mxu0 %v2978_v39  ;;  %2519 = vmatprep.subr.bf16.mxu1 %v2981_v44  ;;  %v2523_v39 = vpack.c.bf16 %v1846_v38, %v1845_v37  ;;  %v2776_v44 = vmov 0.0|0.0  }
 0x6c2   :  { %2489 = vmatpush1.bf16.msra.mxu0 %v2984_v48  ;;  %2521 = vmatpush1.bf16.msra.mxu1 %v2988_v49  ;;  %v1847_v48 = vld [vmem:[#allocation14 + $0x10] sm:$0xff]  ;;  %v1848_v49 = vld [vmem:[#allocation14 + $0x18] sm:$0xff] }
 0x6c3   :  { %2522 = vmatprep.subr.bf16.mxu0 %v2776_v44  ;;  %v2526_v11 = vpack.c.bf16 %v1848_v49, %v1847_v48 }
 0x778   :  { %v1528_v10 = vpop.f32.mrb[12].mxu0  ;;  %v1599_v14 = vpop.f32.mrb[12].mxu1 }
 0x779   :  { %v1530_v18 = vpop.f32.mrb[13].mxu0  ;;  %v1601_v19 = vpop.f32.mrb[13].mxu1 }
 0x77a   :  { %v1608_v23 = vcombine.low %v1528_v10, %v1530_v18  ;;  %v1609_v27 = vcombine.low %v1599_v14, %v1601_v19 }
 0x77c   :  { %v1616_v28 = vrot.slane %v1608_v23, %v3029_v56  ;;  %v1623_v32 = vrot.slane %v1609_v27, %v3029_v56 }
 0x77e   :  { %v1624_v36 = vcombine.low %v1616_v28, %v1623_v32 }
 0x780   :  { %v1631_v40 = vrot.slane %v1624_v36, %v3029_v56 }
 0x782   :  { %v1633_v45 = vadd.f32 %v1631_v40, %v1461_v41 }
 0x784   :  { %v1634_v52 = vmul.f32 %v1633_v45, %v3037_v16 }
 0x786   :  { %2589 = vtanh.f32 %v1634_v52  ;;  %v1957_v52 = vld [vmem:[#allocation15] ss:$0 sm:$0xff] }
 0x790   :  { %v2590_v53 = vpop.eup %2589 }
 0x791   :  { %v1636_v54 = vmul.f32 %v2590_v53, %v3037_v16 }
 0x793   :  { %v1637_v58 = vadd.f32 %v1636_v54, %v3043_v31 }
 0x795   :  { %v1639_v1 = vrot.slane %v1637_v58, 1  ;;  %v1642_v2 = vrot.slane %v1637_v58, 3  ;;  %v1647_v21 = vrot.slane %v1637_v58, 2 }
 0x797   :  { %v1641_v3 = vmul.f32 %v1639_v1, %v1454_v63  ;;  %v1644_v8 = vmul.f32 %v1642_v2, %v1637_v58 }
 0x799   :  { %v3285_v17 = vadd.f32 %v1644_v8, %v1641_v3 }
 0x79b   :  { %2591 = vtanh.f32 %v3285_v17 }
 0x7a5   :  { %v2592_v22 = vpop.eup %2591 }
 0x7a6   :  { %v1649_v29 = vmul.f32 %v2592_v22, %v1647_v21 }
 0x7a8   :  { %1650 = vst [vmem:[#allocation3 + $0x6] sm:$0x1] %v1649_v29  ;;  %1718 = vmatmul.mubr.f32.vlgmr.msra.gmra.mrb[14].mxu0 %v1649_v29  ;;  %1789 = vmatmul.mubr.f32.vlgmr.msra.gmra.mrb[14].mxu1 %v1649_v29 }
 0x7a9   :  { %2524 = vmatpush3.bf16.msra.mxu0 %v2523_v39  ;;  %2007 = vmatprep.mubr.msk.f32.mxu0 %vm2777_vm0, %v2771_v0 }
 0x7aa   :  { %2525 = vmatprep.subr.bf16.mxu0 %v2776_v44 }
 0x7ad   :  { %2527 = vmatpush3.bf16.msra.mxu0 %v2526_v11 }
 0x7ae   :  { %2528 = vmatprep.subr.bf16.mxu0 %v2776_v44 }
 0x7b1   :  { %2530 = vmatpush3.bf16.msra.mxu0 %v2529_v15 }
 0x7b2   :  { %2531 = vmatprep.subr.bf16.mxu0 %v2776_v44 }
 0x7b5   :  { %2533 = vmatpush3.bf16.msra.mxu0 %v2532_v24 }
 0x7b6   :  { %2534 = vmatprep.subr.bf16.mxu0 %v2776_v44 }
 0x7b9   :  { %2536 = vmatpush3.bf16.msra.mxu0 %v2535_v30 }
 0x7ba   :  { %2537 = vmatprep.subr.bf16.mxu0 %v2776_v44 }
 0x7bd   :  { %2539 = vmatpush3.bf16.msra.mxu0 %v2538_v35 }
 0x7be   :  { %2540 = vmatprep.subr.bf16.mxu0 %v2776_v44 }
 0x7c1   :  { %2542 = vmatpush3.bf16.msra.mxu0 %v2541_v47 }
 0x7c2   :  { %2543 = vmatprep.subr.bf16.mxu0 %v2776_v44 }
 0x7c5   :  { %2545 = vmatpush3.bf16.msra.mxu0 %v2544_v46 }
 0x87b   :  { %v1719_v5 = vpop.f32.mrb[14].mxu0  ;;  %v1790_v9 = vpop.f32.mrb[14].mxu1 }
 0x87c   :  { %v1721_v57 = vpop.f32.mrb[15].mxu0  ;;  %v1792_v59 = vpop.f32.mrb[15].mxu1 }
 0x87d   :  { %v1799_v60 = vcombine.low %v1719_v5, %v1721_v57  ;;  %v1800_v61 = vcombine.low %v1790_v9, %v1792_v59 }
 0x87f   :  { %v1807_v62 = vrot.slane %v1799_v60, %v3029_v56  ;;  %v1814_v63 = vrot.slane %v1800_v61, %v3029_v56 }
 0x881   :  { %v1815_v4 = vcombine.low %v1807_v62, %v1814_v63 }
 0x883   :  { %v1822_v6 = vrot.slane %v1815_v4, %v3029_v56 }
 0x885   :  { %v1824_v10 = vadd.f32 %v1822_v6, %v1652_v7 }
 0x887   :  { %v1825_v14 = vmul.f32 %v1824_v10, %v3037_v16 }
 0x889   :  { %2593 = vtanh.f32 %v1825_v14 }
 0x893   :  { %v2594_v0 = vpop.eup %2593 }
 0x894   :  { %v1827_v18 = vmul.f32 %v2594_v0, %v3037_v16 }
 0x896   :  { %v1828_v19 = vadd.f32 %v1827_v18, %v3043_v31 }
 0x898   :  { %v1830_v23 = vrot.slane %v1828_v19, 1  ;;  %v1833_v27 = vrot.slane %v1828_v19, 3  ;;  %v1838_v40 = vrot.slane %v1828_v19, 2 }
 0x89a   :  { %v1832_v28 = vmul.f32 %v1830_v23, %v3285_v17  ;;  %v1835_v32 = vmul.f32 %v1833_v27, %v1828_v19 }
 0x89c   :  { %v1836_v36 = vadd.f32 %v1835_v32, %v1832_v28 }
 0x89e   :  { %2595 = vtanh.f32 %v1836_v36  ;;  %1843 = vst [vmem:[#allocation5] sm:$0x1] %v1836_v36 }
 0x8a8   :  { %v2596_v56 = vpop.eup %2595 }
 0x8a9   :  { %v1840_v41 = vmul.f32 %v2596_v56, %v1838_v40 }
 0x8ab   :  { %1842 = vst [vmem:[#allocation4] sm:$0x1] %v1840_v41  ;;  %1841 = vst [vmem:[#allocation3 + $0x7] sm:$0x1] %v1840_v41 }
 0x8b2   :  { %v1844_v45 = vld [vmem:[#allocation3] sm:$0xff] }
 0x8b3   :  { %2008 = vmatmul.mubr.f32.vlgmr.msra.gmra.mrb[16].mxu0 %v1844_v45 }
 0x986   :  { %v1934_v16 = vpop.f32.mrb[16].mxu0 }
 0x987   :  { %v1935_v31 = vadd.f32 %v1957_v52, %v1934_v16  ;;  %v2009_v53 = vpop.f32.mrb[17].mxu0 }
 0x989   :  { %1938 = vst [vmem:[#allocation17] sm:$0xff] %v1935_v31 }
 0x98a   :  { %2740 = shalt.err (!%p2737_p10)
}
 0x98b   :  { %s2741_s21 = scalar_lea.hbm %s3314_s6, 128 }
 0x98c   :  { %p2742_p11 = scmp.ne.s32.totalorder %s3314_s6, %s2741_s21  ;;  %p2745_p12 = scmp.lt.u32.totalorder %s2741_s21, %s3314_s6 }
 0x98e   :  { %p2747_p13 = pnand %p2745_p12, %p2742_p11 }
 0x990   :  { %2750 = shalt.err (!%p2747_p13)
}
 0x991   :  { %1948 = dma.vmem_to_hbm [thread:$0]  %s1946_s18, 128, %s3314_s6, [#allocation8]  }
 0x992   :  { %2759 = dma.done.wait [#allocation8], 128  }
 0x993   :  { %2760 = vsyncadd [#allocation8], 4294967168 }
 0x994   :  { %1952 = vsyncpa [#allocation7], 1 }
 0x995   :  { %1953 = vsyncpa [#allocation10], 1 }
 0x996   :  { %1954 = vsyncpa [#allocation13], 1 }
 0x997   :  { %1955 = vsyncpa [#allocation16], 1 }
 0x998   :  { %1956 = vsyncpa [#allocation8], 1 }

</bundles_post_ra>
